<compile_context>
chip_gen: v7x
topology: tpu7x:2x2x1
jax: 0.10.0
libtpu: 0.0.40
codegen_flags: <defaults>
</compile_context>

<pallas_src>
import functools

import jax
import jax.numpy as jnp
import numpy as np
from jax.experimental import pallas as pl
from jax.experimental.pallas import tpu as pltpu


def _round_up(n, m):
    return -(-n // m) * m


# ---------------------------------------------------------------------------
# Fused Inception kernel (Nb images per grid step)
# ---------------------------------------------------------------------------

def _inception_kernel(x_ref,
                      wf_ref, bf_ref,          # fused 1x1 (branches 1,2,3)
                      w2b_ref, b2b_ref,        # branch2 3x3
                      w3b_ref, b3b_ref,        # branch3 3x3 (a)
                      w3c_ref, b3c_ref,        # branch3 3x3 (b)
                      w4_ref, b4_ref,          # branch4 1x1 (after maxpool)
                      o_ref, *, H, W, c1, c1p, c2p, c3p):
    HW = H * W
    x = x_ref[...]                 # (Cin, L) with L = Nb*HW; lanes dense
    L = x.shape[1]
    cdt = x.dtype                  # compute dtype (f32 or bf16)

    # ---- 3x3 window taps: per-image lane shifts + boundary masks (hoisted,
    # computed once, reused by both 3x3 convs of every branch and the maxpool).
    pos = jax.lax.broadcasted_iota(jnp.int32, (1, L), 1)
    p = pos % HW                   # position within its own image
    xcol = p % W
    taps = []                      # (delta, bool mask, float mask)
    for dy in (-1, 0, 1):
        for dx in (-1, 0, 1):
            delta = dy * W + dx
            valid = ((xcol + dx >= 0) & (xcol + dx < W)
                     & (p + delta >= 0) & (p + delta < HW))
            taps.append((delta, valid, valid.astype(cdt)))

    def shift(t, delta):
        # shifted[c, l] = t[c, l + delta]; wrap-around / cross-image lanes are
        # always masked out by the tap masks above.
        if delta == 0:
            return t
        return pltpu.roll(t, (-delta) % L, axis=1)

    def relu_bias(acc, b_ref):
        return jnp.maximum(acc + b_ref[...], 0.0)     # f32

    def conv3x3(t, w_ref, b_ref):
        # t: (Cin_p', L); w: (Cout, 9*Cin_p); im2col stack -> one MXU dot.
        cin_p = w_ref.shape[1] // 9
        pad = cin_p - t.shape[0]
        if pad > 0:  # (unused at these sizes; keeps alignment in general)
            t = jnp.concatenate(
                [t, jnp.zeros((pad, t.shape[1]), t.dtype)], axis=0)
        stacked = jnp.concatenate([shift(t, d) * mf for d, _, mf in taps],
                                  axis=0)             # (9*Cin_p, L)
        acc = jnp.dot(w_ref[...], stacked, preferred_element_type=jnp.float32)
        return relu_bias(acc, b_ref)

    # ---- fused 1x1 over x for branches 1, 2, 3 (one wide MXU dot)
    y = relu_bias(jnp.dot(wf_ref[...], x, preferred_element_type=jnp.float32),
                  bf_ref)

    # branch1: 1x1 -> store immediately (channel concat = sublane slice store)
    o_ref[0:c1, :] = y[0:c1].astype(o_ref.dtype)
    off = c1

    # branch2: (fused 1x1) -> 3x3
    t2 = y[c1p:c1p + c2p].astype(cdt)
    out2 = conv3x3(t2, w2b_ref, b2b_ref)
    o_ref[off:off + out2.shape[0], :] = out2.astype(o_ref.dtype)
    off += out2.shape[0]

    # branch3: (fused 1x1) -> 3x3 -> 3x3
    t3 = y[c1p + c2p:c1p + c2p + c3p].astype(cdt)
    t3 = conv3x3(t3, w3b_ref, b3b_ref).astype(cdt)
    out3 = conv3x3(t3, w3c_ref, b3c_ref)
    o_ref[off:off + out3.shape[0], :] = out3.astype(o_ref.dtype)
    off += out3.shape[0]

    # branch4: 3x3 maxpool (stride 1, pad 1) -> 1x1
    m = None
    for d, vb, _ in taps:
        cand = jnp.where(vb, shift(x, d), -jnp.inf)   # center tap always valid
        m = cand if m is None else jnp.maximum(m, cand)
    out4 = relu_bias(jnp.dot(w4_ref[...], m,
                             preferred_element_type=jnp.float32), b4_ref)
    o_ref[off:off + out4.shape[0], :] = out4.astype(o_ref.dtype)


# ---------------------------------------------------------------------------
# Wrapper: layout / weight prep + pallas_call
# ---------------------------------------------------------------------------

def inception_forward(x_nchw, params, *, compute_dtype=jnp.float32,
                      images_per_step=None):
    N, cin, H, W = x_nchw.shape
    HW = H * W
    gran = 8  # f32 sublane granule; keeps intermediate slices/concats aligned.
    # NOTE: branch output channel counts that are multiples of 8 keep the four
    # concat stores unmasked (true here: all 8). Otherwise correctness holds
    # but stores become masked (perf only).

    # --- fuse the three 1x1 convs that read x (branches 1, 2, 3)
    w_parts, b_parts, sizes = [], [], []
    for key in ("b1_1x1", "b2_1x1", "b3_1x1"):
        w, b = params[key]
        co = w.shape[0]
        cop = _round_up(co, gran)
        wp = jnp.zeros((cop, cin), jnp.float32).at[:co].set(w[:, :, 0, 0])
        bp = jnp.zeros((cop, 1), jnp.float32).at[:co, 0].set(b)
        w_parts.append(wp)
        b_parts.append(bp)
        sizes.append((co, cop))
    wf = jnp.concatenate(w_parts, axis=0).astype(compute_dtype)
    bf = jnp.concatenate(b_parts, axis=0)                 # bias stays f32
    (c1, c1p), (_c2, c2p), (_c3, c3p) = sizes

    # --- 3x3 convs: (Cout, Cin, 3, 3) -> (Cout, 9*Cin_p), tap-major columns
    def prep3(wb, cin_real, cin_pad):
        w, b = wb
        co = w.shape[0]
        wp = jnp.zeros((co, 9, cin_pad), jnp.float32)
        wp = wp.at[:, :, :cin_real].set(
            jnp.transpose(w, (0, 2, 3, 1)).reshape(co, 9, cin_real))
        return (wp.reshape(co, 9 * cin_pad).astype(compute_dtype),
                b.reshape(-1, 1).astype(jnp.float32))

    ch3x3 = params["b2_3x3"][0].shape[0]
    ch5x5 = params["b3_3x3a"][0].shape[0]
    pool_planes = params["b4_1x1"][0].shape[0]

    w2b, b2b = prep3(params["b2_3x3"], params["b2_3x3"][0].shape[1], c2p)
    w3b, b3b = prep3(params["b3_3x3a"], params["b3_3x3a"][0].shape[1], c3p)
    w3c, b3c = prep3(params["b3_3x3b"], ch5x5, _round_up(ch5x5, gran))
    w4 = params["b4_1x1"][0][:, :, 0, 0].astype(compute_dtype)
    b4 = params["b4_1x1"][1].reshape(-1, 1).astype(jnp.float32)

    ctot = c1 + ch3x3 + ch5x5 + pool_planes

    # --- grid: Nb images per step; default keeps >= 2 parallel steps so both
    # v7x TensorCores stay busy, while batching as much as possible per step.
    if images_per_step is None:
        if N >= 2:
            images_per_step = max(d for d in range(1, N + 1)
                                  if N % d == 0 and N // d >= 2)
        else:
            images_per_step = 1
    nb = images_per_step
    assert N % nb == 0
    steps = N // nb
    L = nb * HW

    # channels-on-sublanes, (images x spatial) on lanes: contiguous collapse.
    x2 = (jnp.transpose(x_nchw, (1, 0, 2, 3))
          .reshape(cin, N * HW).astype(compute_dtype))

    flat = [wf, bf, w2b, b2b, w3b, b3b, w3c, b3c, w4, b4]
    param_specs = [pl.BlockSpec(p.shape, (lambda n, r=p.ndim: (0,) * r))
                   for p in flat]

    out = pl.pallas_call(
        functools.partial(_inception_kernel, H=H, W=W,
                          c1=c1, c1p=c1p, c2p=c2p, c3p=c3p),
        out_shape=jax.ShapeDtypeStruct((ctot, N * HW), jnp.float32),
        grid=(steps,),
        in_specs=[pl.BlockSpec((cin, L), lambda n: (0, n))] + param_specs,
        out_specs=pl.BlockSpec((ctot, L), lambda n: (0, n)),
        compiler_params=pltpu.CompilerParams(
            dimension_semantics=("parallel",)),
    )(x2, *flat)

    return jnp.transpose(out.reshape(ctot, N, H, W), (1, 0, 2, 3))


# ---------------------------------------------------------------------------
# Deterministic parameter init (torch layout) + BN folding (eval mode)
# ---------------------------------------------------------------------------

def _make_conv_bn_params(key, cin, cout, k):
    k1, k2, k3, k4, k5, k6 = jax.random.split(key, 6)
    fan_in = cin * k * k
    bound = 1.0 / np.sqrt(fan_in)
    w = jax.random.uniform(k1, (cout, cin, k, k), jnp.float32, -bound, bound)
    b = jax.random.uniform(k2, (cout,), jnp.float32, -bound, bound)
    gamma = jax.random.uniform(k3, (cout,), jnp.float32, 0.5, 1.5)
    beta = 0.1 * jax.random.normal(k4, (cout,), jnp.float32)
    mean = 0.1 * jax.random.normal(k5, (cout,), jnp.float32)
    var = jax.random.uniform(k6, (cout,), jnp.float32, 0.5, 1.5)
    eps = 1e-5
    s = gamma / jnp.sqrt(var + eps)
    w_eff = w * s[:, None, None, None]     # (cout, cin, k, k), torch layout
    b_eff = (b - mean) * s + beta          # (cout,)
    return w_eff, b_eff


def init_inception_params(key, inplanes, ch1x1, ch3x3red, ch3x3,
                          ch5x5red, ch5x5, pool_planes):
    keys = jax.random.split(key, 7)
    return {
        "b1_1x1": _make_conv_bn_params(keys[0], inplanes, ch1x1, 1),
        "b2_1x1": _make_conv_bn_params(keys[1], inplanes, ch3x3red, 1),
        "b2_3x3": _make_conv_bn_params(keys[2], ch3x3red, ch3x3, 3),
        "b3_1x1": _make_conv_bn_params(keys[3], inplanes, ch5x5red, 1),
        "b3_3x3a": _make_conv_bn_params(keys[4], ch5x5red, ch5x5, 3),
        "b3_3x3b": _make_conv_bn_params(keys[5], ch5x5, ch5x5, 3),
        "b4_1x1": _make_conv_bn_params(keys[6], inplanes, pool_planes, 1),
    }


# ---------------------------------------------------------------------------
# Pure-JAX reference (correctness check)
# ---------------------------------------------------------------------------

def _ref_conv_bn_relu(x, w, b, pad):
    y = jax.lax.conv_general_dilated(
        x, w, (1, 1), [(pad, pad), (pad, pad)],
        dimension_numbers=("NCHW", "OIHW", "NCHW"))
    return jnp.maximum(y + b[None, :, None, None], 0.0)


def _ref_maxpool(x):
    return jax.lax.reduce_window(
        x, -jnp.inf, jax.lax.max, (1, 1, 3, 3), (1, 1, 1, 1),
        [(0, 0), (0, 0), (1, 1), (1, 1)])


def inception_reference(x, params):
    out1 = _ref_conv_bn_relu(x, *params["b1_1x1"], 0)
    t = _ref_conv_bn_relu(x, *params["b2_1x1"], 0)
    out2 = _ref_conv_bn_relu(t, *params["b2_3x3"], 1)
    t = _ref_conv_bn_relu(x, *params["b3_1x1"], 0)
    t = _ref_conv_bn_relu(t, *params["b3_3x3a"], 1)
    out3 = _ref_conv_bn_relu(t, *params["b3_3x3b"], 1)
    t = _ref_maxpool(x)
    out4 = _ref_conv_bn_relu(t, *params["b4_1x1"], 0)
    return jnp.concatenate([out1, out2, out3, out4], axis=1)


# ---------------------------------------------------------------------------

if __name__ == "__main__":
    key = jax.random.PRNGKey(0)
    k_x, k_p = jax.random.split(key)

    # Small shapes consistent with the module: N=2, C=4, H=W=16.
    N, C, H, W = 2, 4, 16, 16
    inplanes, ch1x1, ch3x3red, ch3x3, ch5x5red, ch5x5, pool_planes = \
        C, 8, 4, 8, 4, 8, 8

    x = jax.random.normal(k_x, (N, C, H, W), jnp.float32)
    params = init_inception_params(k_p, inplanes, ch1x1, ch3x3red, ch3x3,
                                   ch5x5red, ch5x5, pool_planes)

    ref = jax.block_until_ready(inception_reference(x, params))

    fwd = jax.jit(inception_forward,
                  static_argnames=("compute_dtype", "images_per_step"))

    # f32, one image per step (2 parallel grid steps -> both v7x cores busy)
    out = jax.block_until_ready(fwd(x, params))
    assert out.shape == (N, ch1x1 + ch3x3 + ch5x5 + pool_planes, H, W)
    np.testing.assert_allclose(np.asarray(out), np.asarray(ref),
                               rtol=1e-4, atol=1e-4)

    # f32, both images in one grid step (wide Nb*HW lane dim)
    out_b = jax.block_until_ready(fwd(x, params, images_per_step=2))
    np.testing.assert_allclose(np.asarray(out_b), np.asarray(ref),
                               rtol=1e-4, atol=1e-4)

    # bf16 operands (v6e/v7x MXU-native path), f32 accumulation; loose check.
    out_bf16 = jax.block_until_ready(
        fwd(x, params, compute_dtype=jnp.bfloat16))
    np.testing.assert_allclose(np.asarray(out_bf16), np.asarray(ref),
                               rtol=1e-1, atol=1e-1)

    print("KERNEL_OK")
</pallas_src>

<mosaic_0001>
module attributes {stable_mosaic.version = 11 : i64} {
  func.func @_inception_kernel(%arg0: i32, %arg1: memref<4x256xf32, #tpu.memory_space<vmem>>, %arg2: memref<24x4xf32, #tpu.memory_space<vmem>>, %arg3: memref<24x1xf32, #tpu.memory_space<vmem>>, %arg4: memref<8x72xf32, #tpu.memory_space<vmem>>, %arg5: memref<8x1xf32, #tpu.memory_space<vmem>>, %arg6: memref<8x72xf32, #tpu.memory_space<vmem>>, %arg7: memref<8x1xf32, #tpu.memory_space<vmem>>, %arg8: memref<8x72xf32, #tpu.memory_space<vmem>>, %arg9: memref<8x1xf32, #tpu.memory_space<vmem>>, %arg10: memref<8x4xf32, #tpu.memory_space<vmem>>, %arg11: memref<8x1xf32, #tpu.memory_space<vmem>>, %arg12: memref<32x256xf32, #tpu.memory_space<vmem>>) attributes {dimension_semantics = [#tpu.dimension_semantics<parallel>], iteration_bounds = array<i64: 2>, scalar_prefetch = 0 : i64, scratch_operands = 0 : i64, tpu.core_type = #tpu.core_type<tc>, window_params = [{transform_indices = @transform_0, window_bounds = array<i64: 4, 256>}, {pipeline_mode = #tpu.pipeline_mode<synchronous>, transform_indices = @transform_1, window_bounds = array<i64: 24, 4>}, {pipeline_mode = #tpu.pipeline_mode<synchronous>, transform_indices = @transform_2, window_bounds = array<i64: 24, 1>}, {pipeline_mode = #tpu.pipeline_mode<synchronous>, transform_indices = @transform_3, window_bounds = array<i64: 8, 72>}, {pipeline_mode = #tpu.pipeline_mode<synchronous>, transform_indices = @transform_4, window_bounds = array<i64: 8, 1>}, {pipeline_mode = #tpu.pipeline_mode<synchronous>, transform_indices = @transform_5, window_bounds = array<i64: 8, 72>}, {pipeline_mode = #tpu.pipeline_mode<synchronous>, transform_indices = @transform_6, window_bounds = array<i64: 8, 1>}, {pipeline_mode = #tpu.pipeline_mode<synchronous>, transform_indices = @transform_7, window_bounds = array<i64: 8, 72>}, {pipeline_mode = #tpu.pipeline_mode<synchronous>, transform_indices = @transform_8, window_bounds = array<i64: 8, 1>}, {pipeline_mode = #tpu.pipeline_mode<synchronous>, transform_indices = @transform_9, window_bounds = array<i64: 8, 4>}, {pipeline_mode = #tpu.pipeline_mode<synchronous>, transform_indices = @transform_10, window_bounds = array<i64: 8, 1>}, {transform_indices = @transform_11, window_bounds = array<i64: 32, 256>}]} {
    %c0 = arith.constant 0 : index
    %c0_0 = arith.constant 0 : index
    %0 = vector.load %arg1[%c0, %c0_0] : memref<4x256xf32, #tpu.memory_space<vmem>>, vector<4x256xf32>
    %1 = tpu.iota {dimensions = array<i32: 1>} : vector<1x256xi32>
    %c256_i32 = arith.constant 256 : i32
    %c0_i32 = arith.constant 0 : i32
    %2 = arith.cmpi eq, %c256_i32, %c0_i32 : i32
    %c1_i32 = arith.constant 1 : i32
    %3 = arith.select %2, %c1_i32, %c256_i32 : i32
    %4 = vector.broadcast %3 : i32 to vector<1x256xi32>
    %5 = arith.remsi %1, %4 : vector<1x256xi32>
    %c0_i32_1 = arith.constant 0 : i32
    %6 = vector.broadcast %c0_i32_1 : i32 to vector<1x256xi32>
    %7 = arith.cmpi ne, %5, %6 : vector<1x256xi32>
    %c0_i32_2 = arith.constant 0 : i32
    %8 = vector.broadcast %c0_i32_2 : i32 to vector<1x256xi32>
    %9 = arith.cmpi slt, %5, %8 : vector<1x256xi32>
    %c0_i32_3 = arith.constant 0 : i32
    %10 = arith.cmpi slt, %3, %c0_i32_3 : i32
    %11 = vector.broadcast %10 : i1 to vector<1x256xi1>
    %12 = vector.broadcast %11 : vector<1x256xi1> to vector<1x256xi1>
    %13 = arith.xori %9, %12 : vector<1x256xi1>
    %14 = arith.andi %13, %7 : vector<1x256xi1>
    %15 = vector.broadcast %3 : i32 to vector<1x256xi32>
    %16 = arith.addi %5, %15 : vector<1x256xi32>
    %17 = arith.select %14, %16, %5 : vector<1x256xi1>, vector<1x256xi32>
    %c16_i32 = arith.constant 16 : i32
    %c0_i32_4 = arith.constant 0 : i32
    %18 = arith.cmpi eq, %c16_i32, %c0_i32_4 : i32
    %c1_i32_5 = arith.constant 1 : i32
    %19 = arith.select %18, %c1_i32_5, %c16_i32 : i32
    %20 = vector.broadcast %19 : i32 to vector<1x256xi32>
    %21 = arith.remsi %17, %20 : vector<1x256xi32>
    %c0_i32_6 = arith.constant 0 : i32
    %22 = vector.broadcast %c0_i32_6 : i32 to vector<1x256xi32>
    %23 = arith.cmpi ne, %21, %22 : vector<1x256xi32>
    %c0_i32_7 = arith.constant 0 : i32
    %24 = vector.broadcast %c0_i32_7 : i32 to vector<1x256xi32>
    %25 = arith.cmpi slt, %21, %24 : vector<1x256xi32>
    %c0_i32_8 = arith.constant 0 : i32
    %26 = arith.cmpi slt, %19, %c0_i32_8 : i32
    %27 = vector.broadcast %26 : i1 to vector<1x256xi1>
    %28 = vector.broadcast %27 : vector<1x256xi1> to vector<1x256xi1>
    %29 = arith.xori %25, %28 : vector<1x256xi1>
    %30 = arith.andi %29, %23 : vector<1x256xi1>
    %31 = vector.broadcast %19 : i32 to vector<1x256xi32>
    %32 = arith.addi %21, %31 : vector<1x256xi32>
    %33 = arith.select %30, %32, %21 : vector<1x256xi1>, vector<1x256xi32>
    %c-1_i32 = arith.constant -1 : i32
    %34 = vector.broadcast %c-1_i32 : i32 to vector<1x256xi32>
    %35 = arith.addi %33, %34 : vector<1x256xi32>
    %c0_i32_9 = arith.constant 0 : i32
    %36 = vector.broadcast %c0_i32_9 : i32 to vector<1x256xi32>
    %37 = arith.cmpi sge, %35, %36 : vector<1x256xi32>
    %c-1_i32_10 = arith.constant -1 : i32
    %38 = vector.broadcast %c-1_i32_10 : i32 to vector<1x256xi32>
    %39 = arith.addi %33, %38 : vector<1x256xi32>
    %c16_i32_11 = arith.constant 16 : i32
    %40 = vector.broadcast %c16_i32_11 : i32 to vector<1x256xi32>
    %41 = arith.cmpi slt, %39, %40 : vector<1x256xi32>
    %42 = arith.andi %37, %41 : vector<1x256xi1>
    %c-17_i32 = arith.constant -17 : i32
    %43 = vector.broadcast %c-17_i32 : i32 to vector<1x256xi32>
    %44 = arith.addi %17, %43 : vector<1x256xi32>
    %c0_i32_12 = arith.constant 0 : i32
    %45 = vector.broadcast %c0_i32_12 : i32 to vector<1x256xi32>
    %46 = arith.cmpi sge, %44, %45 : vector<1x256xi32>
    %47 = arith.andi %42, %46 : vector<1x256xi1>
    %c-17_i32_13 = arith.constant -17 : i32
    %48 = vector.broadcast %c-17_i32_13 : i32 to vector<1x256xi32>
    %49 = arith.addi %17, %48 : vector<1x256xi32>
    %c256_i32_14 = arith.constant 256 : i32
    %50 = vector.broadcast %c256_i32_14 : i32 to vector<1x256xi32>
    %51 = arith.cmpi slt, %49, %50 : vector<1x256xi32>
    %52 = arith.andi %47, %51 : vector<1x256xi1>
    %53 = arith.extui %52 : vector<1x256xi1> to vector<1x256xi32>
    %54 = arith.sitofp %53 : vector<1x256xi32> to vector<1x256xf32>
    %c0_i32_15 = arith.constant 0 : i32
    %55 = vector.broadcast %c0_i32_15 : i32 to vector<1x256xi32>
    %56 = arith.addi %33, %55 : vector<1x256xi32>
    %c0_i32_16 = arith.constant 0 : i32
    %57 = vector.broadcast %c0_i32_16 : i32 to vector<1x256xi32>
    %58 = arith.cmpi sge, %56, %57 : vector<1x256xi32>
    %c0_i32_17 = arith.constant 0 : i32
    %59 = vector.broadcast %c0_i32_17 : i32 to vector<1x256xi32>
    %60 = arith.addi %33, %59 : vector<1x256xi32>
    %c16_i32_18 = arith.constant 16 : i32
    %61 = vector.broadcast %c16_i32_18 : i32 to vector<1x256xi32>
    %62 = arith.cmpi slt, %60, %61 : vector<1x256xi32>
    %63 = arith.andi %58, %62 : vector<1x256xi1>
    %c-16_i32 = arith.constant -16 : i32
    %64 = vector.broadcast %c-16_i32 : i32 to vector<1x256xi32>
    %65 = arith.addi %17, %64 : vector<1x256xi32>
    %c0_i32_19 = arith.constant 0 : i32
    %66 = vector.broadcast %c0_i32_19 : i32 to vector<1x256xi32>
    %67 = arith.cmpi sge, %65, %66 : vector<1x256xi32>
    %68 = arith.andi %63, %67 : vector<1x256xi1>
    %c-16_i32_20 = arith.constant -16 : i32
    %69 = vector.broadcast %c-16_i32_20 : i32 to vector<1x256xi32>
    %70 = arith.addi %17, %69 : vector<1x256xi32>
    %c256_i32_21 = arith.constant 256 : i32
    %71 = vector.broadcast %c256_i32_21 : i32 to vector<1x256xi32>
    %72 = arith.cmpi slt, %70, %71 : vector<1x256xi32>
    %73 = arith.andi %68, %72 : vector<1x256xi1>
    %74 = arith.extui %73 : vector<1x256xi1> to vector<1x256xi32>
    %75 = arith.sitofp %74 : vector<1x256xi32> to vector<1x256xf32>
    %c1_i32_22 = arith.constant 1 : i32
    %76 = vector.broadcast %c1_i32_22 : i32 to vector<1x256xi32>
    %77 = arith.addi %33, %76 : vector<1x256xi32>
    %c0_i32_23 = arith.constant 0 : i32
    %78 = vector.broadcast %c0_i32_23 : i32 to vector<1x256xi32>
    %79 = arith.cmpi sge, %77, %78 : vector<1x256xi32>
    %c1_i32_24 = arith.constant 1 : i32
    %80 = vector.broadcast %c1_i32_24 : i32 to vector<1x256xi32>
    %81 = arith.addi %33, %80 : vector<1x256xi32>
    %c16_i32_25 = arith.constant 16 : i32
    %82 = vector.broadcast %c16_i32_25 : i32 to vector<1x256xi32>
    %83 = arith.cmpi slt, %81, %82 : vector<1x256xi32>
    %84 = arith.andi %79, %83 : vector<1x256xi1>
    %c-15_i32 = arith.constant -15 : i32
    %85 = vector.broadcast %c-15_i32 : i32 to vector<1x256xi32>
    %86 = arith.addi %17, %85 : vector<1x256xi32>
    %c0_i32_26 = arith.constant 0 : i32
    %87 = vector.broadcast %c0_i32_26 : i32 to vector<1x256xi32>
    %88 = arith.cmpi sge, %86, %87 : vector<1x256xi32>
    %89 = arith.andi %84, %88 : vector<1x256xi1>
    %c-15_i32_27 = arith.constant -15 : i32
    %90 = vector.broadcast %c-15_i32_27 : i32 to vector<1x256xi32>
    %91 = arith.addi %17, %90 : vector<1x256xi32>
    %c256_i32_28 = arith.constant 256 : i32
    %92 = vector.broadcast %c256_i32_28 : i32 to vector<1x256xi32>
    %93 = arith.cmpi slt, %91, %92 : vector<1x256xi32>
    %94 = arith.andi %89, %93 : vector<1x256xi1>
    %95 = arith.extui %94 : vector<1x256xi1> to vector<1x256xi32>
    %96 = arith.sitofp %95 : vector<1x256xi32> to vector<1x256xf32>
    %c-1_i32_29 = arith.constant -1 : i32
    %97 = vector.broadcast %c-1_i32_29 : i32 to vector<1x256xi32>
    %98 = arith.addi %33, %97 : vector<1x256xi32>
    %c0_i32_30 = arith.constant 0 : i32
    %99 = vector.broadcast %c0_i32_30 : i32 to vector<1x256xi32>
    %100 = arith.cmpi sge, %98, %99 : vector<1x256xi32>
    %c-1_i32_31 = arith.constant -1 : i32
    %101 = vector.broadcast %c-1_i32_31 : i32 to vector<1x256xi32>
    %102 = arith.addi %33, %101 : vector<1x256xi32>
    %c16_i32_32 = arith.constant 16 : i32
    %103 = vector.broadcast %c16_i32_32 : i32 to vector<1x256xi32>
    %104 = arith.cmpi slt, %102, %103 : vector<1x256xi32>
    %105 = arith.andi %100, %104 : vector<1x256xi1>
    %c-1_i32_33 = arith.constant -1 : i32
    %106 = vector.broadcast %c-1_i32_33 : i32 to vector<1x256xi32>
    %107 = arith.addi %17, %106 : vector<1x256xi32>
    %c0_i32_34 = arith.constant 0 : i32
    %108 = vector.broadcast %c0_i32_34 : i32 to vector<1x256xi32>
    %109 = arith.cmpi sge, %107, %108 : vector<1x256xi32>
    %110 = arith.andi %105, %109 : vector<1x256xi1>
    %c-1_i32_35 = arith.constant -1 : i32
    %111 = vector.broadcast %c-1_i32_35 : i32 to vector<1x256xi32>
    %112 = arith.addi %17, %111 : vector<1x256xi32>
    %c256_i32_36 = arith.constant 256 : i32
    %113 = vector.broadcast %c256_i32_36 : i32 to vector<1x256xi32>
    %114 = arith.cmpi slt, %112, %113 : vector<1x256xi32>
    %115 = arith.andi %110, %114 : vector<1x256xi1>
    %116 = arith.extui %115 : vector<1x256xi1> to vector<1x256xi32>
    %117 = arith.sitofp %116 : vector<1x256xi32> to vector<1x256xf32>
    %c0_i32_37 = arith.constant 0 : i32
    %118 = vector.broadcast %c0_i32_37 : i32 to vector<1x256xi32>
    %119 = arith.addi %33, %118 : vector<1x256xi32>
    %c0_i32_38 = arith.constant 0 : i32
    %120 = vector.broadcast %c0_i32_38 : i32 to vector<1x256xi32>
    %121 = arith.cmpi sge, %119, %120 : vector<1x256xi32>
    %c0_i32_39 = arith.constant 0 : i32
    %122 = vector.broadcast %c0_i32_39 : i32 to vector<1x256xi32>
    %123 = arith.addi %33, %122 : vector<1x256xi32>
    %c16_i32_40 = arith.constant 16 : i32
    %124 = vector.broadcast %c16_i32_40 : i32 to vector<1x256xi32>
    %125 = arith.cmpi slt, %123, %124 : vector<1x256xi32>
    %126 = arith.andi %121, %125 : vector<1x256xi1>
    %c0_i32_41 = arith.constant 0 : i32
    %127 = vector.broadcast %c0_i32_41 : i32 to vector<1x256xi32>
    %128 = arith.addi %17, %127 : vector<1x256xi32>
    %c0_i32_42 = arith.constant 0 : i32
    %129 = vector.broadcast %c0_i32_42 : i32 to vector<1x256xi32>
    %130 = arith.cmpi sge, %128, %129 : vector<1x256xi32>
    %131 = arith.andi %126, %130 : vector<1x256xi1>
    %c0_i32_43 = arith.constant 0 : i32
    %132 = vector.broadcast %c0_i32_43 : i32 to vector<1x256xi32>
    %133 = arith.addi %17, %132 : vector<1x256xi32>
    %c256_i32_44 = arith.constant 256 : i32
    %134 = vector.broadcast %c256_i32_44 : i32 to vector<1x256xi32>
    %135 = arith.cmpi slt, %133, %134 : vector<1x256xi32>
    %136 = arith.andi %131, %135 : vector<1x256xi1>
    %137 = arith.extui %136 : vector<1x256xi1> to vector<1x256xi32>
    %138 = arith.sitofp %137 : vector<1x256xi32> to vector<1x256xf32>
    %c1_i32_45 = arith.constant 1 : i32
    %139 = vector.broadcast %c1_i32_45 : i32 to vector<1x256xi32>
    %140 = arith.addi %33, %139 : vector<1x256xi32>
    %c0_i32_46 = arith.constant 0 : i32
    %141 = vector.broadcast %c0_i32_46 : i32 to vector<1x256xi32>
    %142 = arith.cmpi sge, %140, %141 : vector<1x256xi32>
    %c1_i32_47 = arith.constant 1 : i32
    %143 = vector.broadcast %c1_i32_47 : i32 to vector<1x256xi32>
    %144 = arith.addi %33, %143 : vector<1x256xi32>
    %c16_i32_48 = arith.constant 16 : i32
    %145 = vector.broadcast %c16_i32_48 : i32 to vector<1x256xi32>
    %146 = arith.cmpi slt, %144, %145 : vector<1x256xi32>
    %147 = arith.andi %142, %146 : vector<1x256xi1>
    %c1_i32_49 = arith.constant 1 : i32
    %148 = vector.broadcast %c1_i32_49 : i32 to vector<1x256xi32>
    %149 = arith.addi %17, %148 : vector<1x256xi32>
    %c0_i32_50 = arith.constant 0 : i32
    %150 = vector.broadcast %c0_i32_50 : i32 to vector<1x256xi32>
    %151 = arith.cmpi sge, %149, %150 : vector<1x256xi32>
    %152 = arith.andi %147, %151 : vector<1x256xi1>
    %c1_i32_51 = arith.constant 1 : i32
    %153 = vector.broadcast %c1_i32_51 : i32 to vector<1x256xi32>
    %154 = arith.addi %17, %153 : vector<1x256xi32>
    %c256_i32_52 = arith.constant 256 : i32
    %155 = vector.broadcast %c256_i32_52 : i32 to vector<1x256xi32>
    %156 = arith.cmpi slt, %154, %155 : vector<1x256xi32>
    %157 = arith.andi %152, %156 : vector<1x256xi1>
    %158 = arith.extui %157 : vector<1x256xi1> to vector<1x256xi32>
    %159 = arith.sitofp %158 : vector<1x256xi32> to vector<1x256xf32>
    %c-1_i32_53 = arith.constant -1 : i32
    %160 = vector.broadcast %c-1_i32_53 : i32 to vector<1x256xi32>
    %161 = arith.addi %33, %160 : vector<1x256xi32>
    %c0_i32_54 = arith.constant 0 : i32
    %162 = vector.broadcast %c0_i32_54 : i32 to vector<1x256xi32>
    %163 = arith.cmpi sge, %161, %162 : vector<1x256xi32>
    %c-1_i32_55 = arith.constant -1 : i32
    %164 = vector.broadcast %c-1_i32_55 : i32 to vector<1x256xi32>
    %165 = arith.addi %33, %164 : vector<1x256xi32>
    %c16_i32_56 = arith.constant 16 : i32
    %166 = vector.broadcast %c16_i32_56 : i32 to vector<1x256xi32>
    %167 = arith.cmpi slt, %165, %166 : vector<1x256xi32>
    %168 = arith.andi %163, %167 : vector<1x256xi1>
    %c15_i32 = arith.constant 15 : i32
    %169 = vector.broadcast %c15_i32 : i32 to vector<1x256xi32>
    %170 = arith.addi %17, %169 : vector<1x256xi32>
    %c0_i32_57 = arith.constant 0 : i32
    %171 = vector.broadcast %c0_i32_57 : i32 to vector<1x256xi32>
    %172 = arith.cmpi sge, %170, %171 : vector<1x256xi32>
    %173 = arith.andi %168, %172 : vector<1x256xi1>
    %c15_i32_58 = arith.constant 15 : i32
    %174 = vector.broadcast %c15_i32_58 : i32 to vector<1x256xi32>
    %175 = arith.addi %17, %174 : vector<1x256xi32>
    %c256_i32_59 = arith.constant 256 : i32
    %176 = vector.broadcast %c256_i32_59 : i32 to vector<1x256xi32>
    %177 = arith.cmpi slt, %175, %176 : vector<1x256xi32>
    %178 = arith.andi %173, %177 : vector<1x256xi1>
    %179 = arith.extui %178 : vector<1x256xi1> to vector<1x256xi32>
    %180 = arith.sitofp %179 : vector<1x256xi32> to vector<1x256xf32>
    %c0_i32_60 = arith.constant 0 : i32
    %181 = vector.broadcast %c0_i32_60 : i32 to vector<1x256xi32>
    %182 = arith.addi %33, %181 : vector<1x256xi32>
    %c0_i32_61 = arith.constant 0 : i32
    %183 = vector.broadcast %c0_i32_61 : i32 to vector<1x256xi32>
    %184 = arith.cmpi sge, %182, %183 : vector<1x256xi32>
    %c0_i32_62 = arith.constant 0 : i32
    %185 = vector.broadcast %c0_i32_62 : i32 to vector<1x256xi32>
    %186 = arith.addi %33, %185 : vector<1x256xi32>
    %c16_i32_63 = arith.constant 16 : i32
    %187 = vector.broadcast %c16_i32_63 : i32 to vector<1x256xi32>
    %188 = arith.cmpi slt, %186, %187 : vector<1x256xi32>
    %189 = arith.andi %184, %188 : vector<1x256xi1>
    %c16_i32_64 = arith.constant 16 : i32
    %190 = vector.broadcast %c16_i32_64 : i32 to vector<1x256xi32>
    %191 = arith.addi %17, %190 : vector<1x256xi32>
    %c0_i32_65 = arith.constant 0 : i32
    %192 = vector.broadcast %c0_i32_65 : i32 to vector<1x256xi32>
    %193 = arith.cmpi sge, %191, %192 : vector<1x256xi32>
    %194 = arith.andi %189, %193 : vector<1x256xi1>
    %c16_i32_66 = arith.constant 16 : i32
    %195 = vector.broadcast %c16_i32_66 : i32 to vector<1x256xi32>
    %196 = arith.addi %17, %195 : vector<1x256xi32>
    %c256_i32_67 = arith.constant 256 : i32
    %197 = vector.broadcast %c256_i32_67 : i32 to vector<1x256xi32>
    %198 = arith.cmpi slt, %196, %197 : vector<1x256xi32>
    %199 = arith.andi %194, %198 : vector<1x256xi1>
    %200 = arith.extui %199 : vector<1x256xi1> to vector<1x256xi32>
    %201 = arith.sitofp %200 : vector<1x256xi32> to vector<1x256xf32>
    %c1_i32_68 = arith.constant 1 : i32
    %202 = vector.broadcast %c1_i32_68 : i32 to vector<1x256xi32>
    %203 = arith.addi %33, %202 : vector<1x256xi32>
    %c0_i32_69 = arith.constant 0 : i32
    %204 = vector.broadcast %c0_i32_69 : i32 to vector<1x256xi32>
    %205 = arith.cmpi sge, %203, %204 : vector<1x256xi32>
    %c1_i32_70 = arith.constant 1 : i32
    %206 = vector.broadcast %c1_i32_70 : i32 to vector<1x256xi32>
    %207 = arith.addi %33, %206 : vector<1x256xi32>
    %c16_i32_71 = arith.constant 16 : i32
    %208 = vector.broadcast %c16_i32_71 : i32 to vector<1x256xi32>
    %209 = arith.cmpi slt, %207, %208 : vector<1x256xi32>
    %210 = arith.andi %205, %209 : vector<1x256xi1>
    %c17_i32 = arith.constant 17 : i32
    %211 = vector.broadcast %c17_i32 : i32 to vector<1x256xi32>
    %212 = arith.addi %17, %211 : vector<1x256xi32>
    %c0_i32_72 = arith.constant 0 : i32
    %213 = vector.broadcast %c0_i32_72 : i32 to vector<1x256xi32>
    %214 = arith.cmpi sge, %212, %213 : vector<1x256xi32>
    %215 = arith.andi %210, %214 : vector<1x256xi1>
    %c17_i32_73 = arith.constant 17 : i32
    %216 = vector.broadcast %c17_i32_73 : i32 to vector<1x256xi32>
    %217 = arith.addi %17, %216 : vector<1x256xi32>
    %c256_i32_74 = arith.constant 256 : i32
    %218 = vector.broadcast %c256_i32_74 : i32 to vector<1x256xi32>
    %219 = arith.cmpi slt, %217, %218 : vector<1x256xi32>
    %220 = arith.andi %215, %219 : vector<1x256xi1>
    %221 = arith.extui %220 : vector<1x256xi1> to vector<1x256xi32>
    %222 = arith.sitofp %221 : vector<1x256xi32> to vector<1x256xf32>
    %c0_75 = arith.constant 0 : index
    %c0_76 = arith.constant 0 : index
    %223 = vector.load %arg2[%c0_75, %c0_76] : memref<24x4xf32, #tpu.memory_space<vmem>>, vector<24x4xf32>
    %cst = arith.constant dense<0.000000e+00> : vector<24x256xf32>
    %224 = tpu.matmul %223, %0, %cst {dimension_numbers = #tpu.dot_dimension_numbers<[1], [0], [0], [1], [0, 0, 1, 1], [], []>} : vector<24x4xf32>, vector<4x256xf32>, vector<24x256xf32> -> vector<24x256xf32>
    %c0_77 = arith.constant 0 : index
    %c0_78 = arith.constant 0 : index
    %225 = vector.load %arg3[%c0_77, %c0_78] : memref<24x1xf32, #tpu.memory_space<vmem>>, vector<24x1xf32>
    %226 = vector.broadcast %225 : vector<24x1xf32> to vector<24x256xf32>
    %227 = arith.addf %224, %226 : vector<24x256xf32>
    %cst_79 = arith.constant 0.000000e+00 : f32
    %228 = vector.broadcast %cst_79 : f32 to vector<24x256xf32>
    %229 = arith.maximumf %227, %228 : vector<24x256xf32>
    %230 = vector.extract_strided_slice %229 {offsets = [0, 0], sizes = [8, 256], strides = [1, 1]} : vector<24x256xf32> to vector<8x256xf32>
    %c0_80 = arith.constant 0 : index
    %c0_81 = arith.constant 0 : index
    %231 = vector.load %arg12[%c0_80, %c0_81] : memref<32x256xf32, #tpu.memory_space<vmem>>, vector<8x256xf32>
    tpu.vector_store %arg12[%c0_80, %c0_81], %230 {strides = array<i32>} : memref<32x256xf32, #tpu.memory_space<vmem>>, vector<8x256xf32>,
    %232 = vector.extract_strided_slice %229 {offsets = [8, 0], sizes = [8, 256], strides = [1, 1]} : vector<24x256xf32> to vector<8x256xf32>
    %c17_i32_82 = arith.constant 17 : i32
    %233 = tpu.dynamic_rotate %232 by %c17_i32_82 dim 1 : vector<8x256xf32>, i32 -> vector<8x256xf32>
    %234 = vector.broadcast %54 : vector<1x256xf32> to vector<8x256xf32>
    %235 = arith.mulf %233, %234 : vector<8x256xf32>
    %c16_i32_83 = arith.constant 16 : i32
    %236 = tpu.dynamic_rotate %232 by %c16_i32_83 dim 1 : vector<8x256xf32>, i32 -> vector<8x256xf32>
    %237 = vector.broadcast %75 : vector<1x256xf32> to vector<8x256xf32>
    %238 = arith.mulf %236, %237 : vector<8x256xf32>
    %c15_i32_84 = arith.constant 15 : i32
    %239 = tpu.dynamic_rotate %232 by %c15_i32_84 dim 1 : vector<8x256xf32>, i32 -> vector<8x256xf32>
    %240 = vector.broadcast %96 : vector<1x256xf32> to vector<8x256xf32>
    %241 = arith.mulf %239, %240 : vector<8x256xf32>
    %c1_i32_85 = arith.constant 1 : i32
    %242 = tpu.dynamic_rotate %232 by %c1_i32_85 dim 1 : vector<8x256xf32>, i32 -> vector<8x256xf32>
    %243 = vector.broadcast %117 : vector<1x256xf32> to vector<8x256xf32>
    %244 = arith.mulf %242, %243 : vector<8x256xf32>
    %245 = vector.broadcast %138 : vector<1x256xf32> to vector<8x256xf32>
    %246 = arith.mulf %232, %245 : vector<8x256xf32>
    %c255_i32 = arith.constant 255 : i32
    %247 = tpu.dynamic_rotate %232 by %c255_i32 dim 1 : vector<8x256xf32>, i32 -> vector<8x256xf32>
    %248 = vector.broadcast %159 : vector<1x256xf32> to vector<8x256xf32>
    %249 = arith.mulf %247, %248 : vector<8x256xf32>
    %c241_i32 = arith.constant 241 : i32
    %250 = tpu.dynamic_rotate %232 by %c241_i32 dim 1 : vector<8x256xf32>, i32 -> vector<8x256xf32>
    %251 = vector.broadcast %180 : vector<1x256xf32> to vector<8x256xf32>
    %252 = arith.mulf %250, %251 : vector<8x256xf32>
    %c240_i32 = arith.constant 240 : i32
    %253 = tpu.dynamic_rotate %232 by %c240_i32 dim 1 : vector<8x256xf32>, i32 -> vector<8x256xf32>
    %254 = vector.broadcast %201 : vector<1x256xf32> to vector<8x256xf32>
    %255 = arith.mulf %253, %254 : vector<8x256xf32>
    %c239_i32 = arith.constant 239 : i32
    %256 = tpu.dynamic_rotate %232 by %c239_i32 dim 1 : vector<8x256xf32>, i32 -> vector<8x256xf32>
    %257 = vector.broadcast %222 : vector<1x256xf32> to vector<8x256xf32>
    %258 = arith.mulf %256, %257 : vector<8x256xf32>
    %259 = tpu.concatenate %235, %238, %241, %244, %246, %249, %252, %255, %258 in 0 : vector<8x256xf32>, vector<8x256xf32>, vector<8x256xf32>, vector<8x256xf32>, vector<8x256xf32>, vector<8x256xf32>, vector<8x256xf32>, vector<8x256xf32>, vector<8x256xf32> -> vector<72x256xf32>
    %c0_86 = arith.constant 0 : index
    %c0_87 = arith.constant 0 : index
    %260 = vector.load %arg4[%c0_86, %c0_87] : memref<8x72xf32, #tpu.memory_space<vmem>>, vector<8x72xf32>
    %cst_88 = arith.constant dense<0.000000e+00> : vector<8x256xf32>
    %261 = tpu.matmul %260, %259, %cst_88 {dimension_numbers = #tpu.dot_dimension_numbers<[1], [0], [0], [1], [0, 0, 1, 1], [], []>} : vector<8x72xf32>, vector<72x256xf32>, vector<8x256xf32> -> vector<8x256xf32>
    %c0_89 = arith.constant 0 : index
    %c0_90 = arith.constant 0 : index
    %262 = vector.load %arg5[%c0_89, %c0_90] : memref<8x1xf32, #tpu.memory_space<vmem>>, vector<8x1xf32>
    %263 = vector.broadcast %262 : vector<8x1xf32> to vector<8x256xf32>
    %264 = arith.addf %261, %263 : vector<8x256xf32>
    %cst_91 = arith.constant 0.000000e+00 : f32
    %265 = vector.broadcast %cst_91 : f32 to vector<8x256xf32>
    %266 = arith.maximumf %264, %265 : vector<8x256xf32>
    %c8 = arith.constant 8 : index
    %c0_92 = arith.constant 0 : index
    %267 = vector.load %arg12[%c8, %c0_92] : memref<32x256xf32, #tpu.memory_space<vmem>>, vector<8x256xf32>
    tpu.vector_store %arg12[%c8, %c0_92], %266 {strides = array<i32>} : memref<32x256xf32, #tpu.memory_space<vmem>>, vector<8x256xf32>,
    %268 = vector.extract_strided_slice %229 {offsets = [16, 0], sizes = [8, 256], strides = [1, 1]} : vector<24x256xf32> to vector<8x256xf32>
    %c17_i32_93 = arith.constant 17 : i32
    %269 = tpu.dynamic_rotate %268 by %c17_i32_93 dim 1 : vector<8x256xf32>, i32 -> vector<8x256xf32>
    %270 = vector.broadcast %54 : vector<1x256xf32> to vector<8x256xf32>
    %271 = arith.mulf %269, %270 : vector<8x256xf32>
    %c16_i32_94 = arith.constant 16 : i32
    %272 = tpu.dynamic_rotate %268 by %c16_i32_94 dim 1 : vector<8x256xf32>, i32 -> vector<8x256xf32>
    %273 = vector.broadcast %75 : vector<1x256xf32> to vector<8x256xf32>
    %274 = arith.mulf %272, %273 : vector<8x256xf32>
    %c15_i32_95 = arith.constant 15 : i32
    %275 = tpu.dynamic_rotate %268 by %c15_i32_95 dim 1 : vector<8x256xf32>, i32 -> vector<8x256xf32>
    %276 = vector.broadcast %96 : vector<1x256xf32> to vector<8x256xf32>
    %277 = arith.mulf %275, %276 : vector<8x256xf32>
    %c1_i32_96 = arith.constant 1 : i32
    %278 = tpu.dynamic_rotate %268 by %c1_i32_96 dim 1 : vector<8x256xf32>, i32 -> vector<8x256xf32>
    %279 = vector.broadcast %117 : vector<1x256xf32> to vector<8x256xf32>
    %280 = arith.mulf %278, %279 : vector<8x256xf32>
    %281 = vector.broadcast %138 : vector<1x256xf32> to vector<8x256xf32>
    %282 = arith.mulf %268, %281 : vector<8x256xf32>
    %c255_i32_97 = arith.constant 255 : i32
    %283 = tpu.dynamic_rotate %268 by %c255_i32_97 dim 1 : vector<8x256xf32>, i32 -> vector<8x256xf32>
    %284 = vector.broadcast %159 : vector<1x256xf32> to vector<8x256xf32>
    %285 = arith.mulf %283, %284 : vector<8x256xf32>
    %c241_i32_98 = arith.constant 241 : i32
    %286 = tpu.dynamic_rotate %268 by %c241_i32_98 dim 1 : vector<8x256xf32>, i32 -> vector<8x256xf32>
    %287 = vector.broadcast %180 : vector<1x256xf32> to vector<8x256xf32>
    %288 = arith.mulf %286, %287 : vector<8x256xf32>
    %c240_i32_99 = arith.constant 240 : i32
    %289 = tpu.dynamic_rotate %268 by %c240_i32_99 dim 1 : vector<8x256xf32>, i32 -> vector<8x256xf32>
    %290 = vector.broadcast %201 : vector<1x256xf32> to vector<8x256xf32>
    %291 = arith.mulf %289, %290 : vector<8x256xf32>
    %c239_i32_100 = arith.constant 239 : i32
    %292 = tpu.dynamic_rotate %268 by %c239_i32_100 dim 1 : vector<8x256xf32>, i32 -> vector<8x256xf32>
    %293 = vector.broadcast %222 : vector<1x256xf32> to vector<8x256xf32>
    %294 = arith.mulf %292, %293 : vector<8x256xf32>
    %295 = tpu.concatenate %271, %274, %277, %280, %282, %285, %288, %291, %294 in 0 : vector<8x256xf32>, vector<8x256xf32>, vector<8x256xf32>, vector<8x256xf32>, vector<8x256xf32>, vector<8x256xf32>, vector<8x256xf32>, vector<8x256xf32>, vector<8x256xf32> -> vector<72x256xf32>
    %c0_101 = arith.constant 0 : index
    %c0_102 = arith.constant 0 : index
    %296 = vector.load %arg6[%c0_101, %c0_102] : memref<8x72xf32, #tpu.memory_space<vmem>>, vector<8x72xf32>
    %cst_103 = arith.constant dense<0.000000e+00> : vector<8x256xf32>
    %297 = tpu.matmul %296, %295, %cst_103 {dimension_numbers = #tpu.dot_dimension_numbers<[1], [0], [0], [1], [0, 0, 1, 1], [], []>} : vector<8x72xf32>, vector<72x256xf32>, vector<8x256xf32> -> vector<8x256xf32>
    %c0_104 = arith.constant 0 : index
    %c0_105 = arith.constant 0 : index
    %298 = vector.load %arg7[%c0_104, %c0_105] : memref<8x1xf32, #tpu.memory_space<vmem>>, vector<8x1xf32>
    %299 = vector.broadcast %298 : vector<8x1xf32> to vector<8x256xf32>
    %300 = arith.addf %297, %299 : vector<8x256xf32>
    %cst_106 = arith.constant 0.000000e+00 : f32
    %301 = vector.broadcast %cst_106 : f32 to vector<8x256xf32>
    %302 = arith.maximumf %300, %301 : vector<8x256xf32>
    %c17_i32_107 = arith.constant 17 : i32
    %303 = tpu.dynamic_rotate %302 by %c17_i32_107 dim 1 : vector<8x256xf32>, i32 -> vector<8x256xf32>
    %304 = vector.broadcast %54 : vector<1x256xf32> to vector<8x256xf32>
    %305 = arith.mulf %303, %304 : vector<8x256xf32>
    %c16_i32_108 = arith.constant 16 : i32
    %306 = tpu.dynamic_rotate %302 by %c16_i32_108 dim 1 : vector<8x256xf32>, i32 -> vector<8x256xf32>
    %307 = vector.broadcast %75 : vector<1x256xf32> to vector<8x256xf32>
    %308 = arith.mulf %306, %307 : vector<8x256xf32>
    %c15_i32_109 = arith.constant 15 : i32
    %309 = tpu.dynamic_rotate %302 by %c15_i32_109 dim 1 : vector<8x256xf32>, i32 -> vector<8x256xf32>
    %310 = vector.broadcast %96 : vector<1x256xf32> to vector<8x256xf32>
    %311 = arith.mulf %309, %310 : vector<8x256xf32>
    %c1_i32_110 = arith.constant 1 : i32
    %312 = tpu.dynamic_rotate %302 by %c1_i32_110 dim 1 : vector<8x256xf32>, i32 -> vector<8x256xf32>
    %313 = vector.broadcast %117 : vector<1x256xf32> to vector<8x256xf32>
    %314 = arith.mulf %312, %313 : vector<8x256xf32>
    %315 = vector.broadcast %138 : vector<1x256xf32> to vector<8x256xf32>
    %316 = arith.mulf %302, %315 : vector<8x256xf32>
    %c255_i32_111 = arith.constant 255 : i32
    %317 = tpu.dynamic_rotate %302 by %c255_i32_111 dim 1 : vector<8x256xf32>, i32 -> vector<8x256xf32>
    %318 = vector.broadcast %159 : vector<1x256xf32> to vector<8x256xf32>
    %319 = arith.mulf %317, %318 : vector<8x256xf32>
    %c241_i32_112 = arith.constant 241 : i32
    %320 = tpu.dynamic_rotate %302 by %c241_i32_112 dim 1 : vector<8x256xf32>, i32 -> vector<8x256xf32>
    %321 = vector.broadcast %180 : vector<1x256xf32> to vector<8x256xf32>
    %322 = arith.mulf %320, %321 : vector<8x256xf32>
    %c240_i32_113 = arith.constant 240 : i32
    %323 = tpu.dynamic_rotate %302 by %c240_i32_113 dim 1 : vector<8x256xf32>, i32 -> vector<8x256xf32>
    %324 = vector.broadcast %201 : vector<1x256xf32> to vector<8x256xf32>
    %325 = arith.mulf %323, %324 : vector<8x256xf32>
    %c239_i32_114 = arith.constant 239 : i32
    %326 = tpu.dynamic_rotate %302 by %c239_i32_114 dim 1 : vector<8x256xf32>, i32 -> vector<8x256xf32>
    %327 = vector.broadcast %222 : vector<1x256xf32> to vector<8x256xf32>
    %328 = arith.mulf %326, %327 : vector<8x256xf32>
    %329 = tpu.concatenate %305, %308, %311, %314, %316, %319, %322, %325, %328 in 0 : vector<8x256xf32>, vector<8x256xf32>, vector<8x256xf32>, vector<8x256xf32>, vector<8x256xf32>, vector<8x256xf32>, vector<8x256xf32>, vector<8x256xf32>, vector<8x256xf32> -> vector<72x256xf32>
    %c0_115 = arith.constant 0 : index
    %c0_116 = arith.constant 0 : index
    %330 = vector.load %arg8[%c0_115, %c0_116] : memref<8x72xf32, #tpu.memory_space<vmem>>, vector<8x72xf32>
    %cst_117 = arith.constant dense<0.000000e+00> : vector<8x256xf32>
    %331 = tpu.matmul %330, %329, %cst_117 {dimension_numbers = #tpu.dot_dimension_numbers<[1], [0], [0], [1], [0, 0, 1, 1], [], []>} : vector<8x72xf32>, vector<72x256xf32>, vector<8x256xf32> -> vector<8x256xf32>
    %c0_118 = arith.constant 0 : index
    %c0_119 = arith.constant 0 : index
    %332 = vector.load %arg9[%c0_118, %c0_119] : memref<8x1xf32, #tpu.memory_space<vmem>>, vector<8x1xf32>
    %333 = vector.broadcast %332 : vector<8x1xf32> to vector<8x256xf32>
    %334 = arith.addf %331, %333 : vector<8x256xf32>
    %cst_120 = arith.constant 0.000000e+00 : f32
    %335 = vector.broadcast %cst_120 : f32 to vector<8x256xf32>
    %336 = arith.maximumf %334, %335 : vector<8x256xf32>
    %c16 = arith.constant 16 : index
    %c0_121 = arith.constant 0 : index
    %337 = vector.load %arg12[%c16, %c0_121] : memref<32x256xf32, #tpu.memory_space<vmem>>, vector<8x256xf32>
    tpu.vector_store %arg12[%c16, %c0_121], %336 {strides = array<i32>} : memref<32x256xf32, #tpu.memory_space<vmem>>, vector<8x256xf32>,
    %c17_i32_122 = arith.constant 17 : i32
    %338 = tpu.dynamic_rotate %0 by %c17_i32_122 dim 1 : vector<4x256xf32>, i32 -> vector<4x256xf32>
    %cst_123 = arith.constant 0xFF800000 : f32
    %339 = vector.shape_cast %52 : vector<1x256xi1> to vector<1x256xi1>
    %340 = vector.broadcast %339 : vector<1x256xi1> to vector<4x256xi1>
    %341 = vector.broadcast %cst_123 : f32 to vector<4x256xf32>
    %342 = arith.select %340, %338, %341 : vector<4x256xi1>, vector<4x256xf32>
    %c16_i32_124 = arith.constant 16 : i32
    %343 = tpu.dynamic_rotate %0 by %c16_i32_124 dim 1 : vector<4x256xf32>, i32 -> vector<4x256xf32>
    %cst_125 = arith.constant 0xFF800000 : f32
    %344 = vector.shape_cast %73 : vector<1x256xi1> to vector<1x256xi1>
    %345 = vector.broadcast %344 : vector<1x256xi1> to vector<4x256xi1>
    %346 = vector.broadcast %cst_125 : f32 to vector<4x256xf32>
    %347 = arith.select %345, %343, %346 : vector<4x256xi1>, vector<4x256xf32>
    %348 = arith.maximumf %342, %347 : vector<4x256xf32>
    %c15_i32_126 = arith.constant 15 : i32
    %349 = tpu.dynamic_rotate %0 by %c15_i32_126 dim 1 : vector<4x256xf32>, i32 -> vector<4x256xf32>
    %cst_127 = arith.constant 0xFF800000 : f32
    %350 = vector.shape_cast %94 : vector<1x256xi1> to vector<1x256xi1>
    %351 = vector.broadcast %350 : vector<1x256xi1> to vector<4x256xi1>
    %352 = vector.broadcast %cst_127 : f32 to vector<4x256xf32>
    %353 = arith.select %351, %349, %352 : vector<4x256xi1>, vector<4x256xf32>
    %354 = arith.maximumf %348, %353 : vector<4x256xf32>
    %c1_i32_128 = arith.constant 1 : i32
    %355 = tpu.dynamic_rotate %0 by %c1_i32_128 dim 1 : vector<4x256xf32>, i32 -> vector<4x256xf32>
    %cst_129 = arith.constant 0xFF800000 : f32
    %356 = vector.shape_cast %115 : vector<1x256xi1> to vector<1x256xi1>
    %357 = vector.broadcast %356 : vector<1x256xi1> to vector<4x256xi1>
    %358 = vector.broadcast %cst_129 : f32 to vector<4x256xf32>
    %359 = arith.select %357, %355, %358 : vector<4x256xi1>, vector<4x256xf32>
    %360 = arith.maximumf %354, %359 : vector<4x256xf32>
    %cst_130 = arith.constant 0xFF800000 : f32
    %361 = vector.shape_cast %136 : vector<1x256xi1> to vector<1x256xi1>
    %362 = vector.broadcast %361 : vector<1x256xi1> to vector<4x256xi1>
    %363 = vector.broadcast %cst_130 : f32 to vector<4x256xf32>
    %364 = arith.select %362, %0, %363 : vector<4x256xi1>, vector<4x256xf32>
    %365 = arith.maximumf %360, %364 : vector<4x256xf32>
    %c255_i32_131 = arith.constant 255 : i32
    %366 = tpu.dynamic_rotate %0 by %c255_i32_131 dim 1 : vector<4x256xf32>, i32 -> vector<4x256xf32>
    %cst_132 = arith.constant 0xFF800000 : f32
    %367 = vector.shape_cast %157 : vector<1x256xi1> to vector<1x256xi1>
    %368 = vector.broadcast %367 : vector<1x256xi1> to vector<4x256xi1>
    %369 = vector.broadcast %cst_132 : f32 to vector<4x256xf32>
    %370 = arith.select %368, %366, %369 : vector<4x256xi1>, vector<4x256xf32>
    %371 = arith.maximumf %365, %370 : vector<4x256xf32>
    %c241_i32_133 = arith.constant 241 : i32
    %372 = tpu.dynamic_rotate %0 by %c241_i32_133 dim 1 : vector<4x256xf32>, i32 -> vector<4x256xf32>
    %cst_134 = arith.constant 0xFF800000 : f32
    %373 = vector.shape_cast %178 : vector<1x256xi1> to vector<1x256xi1>
    %374 = vector.broadcast %373 : vector<1x256xi1> to vector<4x256xi1>
    %375 = vector.broadcast %cst_134 : f32 to vector<4x256xf32>
    %376 = arith.select %374, %372, %375 : vector<4x256xi1>, vector<4x256xf32>
    %377 = arith.maximumf %371, %376 : vector<4x256xf32>
    %c240_i32_135 = arith.constant 240 : i32
    %378 = tpu.dynamic_rotate %0 by %c240_i32_135 dim 1 : vector<4x256xf32>, i32 -> vector<4x256xf32>
    %cst_136 = arith.constant 0xFF800000 : f32
    %379 = vector.shape_cast %199 : vector<1x256xi1> to vector<1x256xi1>
    %380 = vector.broadcast %379 : vector<1x256xi1> to vector<4x256xi1>
    %381 = vector.broadcast %cst_136 : f32 to vector<4x256xf32>
    %382 = arith.select %380, %378, %381 : vector<4x256xi1>, vector<4x256xf32>
    %383 = arith.maximumf %377, %382 : vector<4x256xf32>
    %c239_i32_137 = arith.constant 239 : i32
    %384 = tpu.dynamic_rotate %0 by %c239_i32_137 dim 1 : vector<4x256xf32>, i32 -> vector<4x256xf32>
    %cst_138 = arith.constant 0xFF800000 : f32
    %385 = vector.shape_cast %220 : vector<1x256xi1> to vector<1x256xi1>
    %386 = vector.broadcast %385 : vector<1x256xi1> to vector<4x256xi1>
    %387 = vector.broadcast %cst_138 : f32 to vector<4x256xf32>
    %388 = arith.select %386, %384, %387 : vector<4x256xi1>, vector<4x256xf32>
    %389 = arith.maximumf %383, %388 : vector<4x256xf32>
    %c0_139 = arith.constant 0 : index
    %c0_140 = arith.constant 0 : index
    %390 = vector.load %arg10[%c0_139, %c0_140] : memref<8x4xf32, #tpu.memory_space<vmem>>, vector<8x4xf32>
    %cst_141 = arith.constant dense<0.000000e+00> : vector<8x256xf32>
    %391 = tpu.matmul %390, %389, %cst_141 {dimension_numbers = #tpu.dot_dimension_numbers<[1], [0], [0], [1], [0, 0, 1, 1], [], []>} : vector<8x4xf32>, vector<4x256xf32>, vector<8x256xf32> -> vector<8x256xf32>
    %c0_142 = arith.constant 0 : index
    %c0_143 = arith.constant 0 : index
    %392 = vector.load %arg11[%c0_142, %c0_143] : memref<8x1xf32, #tpu.memory_space<vmem>>, vector<8x1xf32>
    %393 = vector.broadcast %392 : vector<8x1xf32> to vector<8x256xf32>
    %394 = arith.addf %391, %393 : vector<8x256xf32>
    %cst_144 = arith.constant 0.000000e+00 : f32
    %395 = vector.broadcast %cst_144 : f32 to vector<8x256xf32>
    %396 = arith.maximumf %394, %395 : vector<8x256xf32>
    %c24 = arith.constant 24 : index
    %c0_145 = arith.constant 0 : index
    %397 = vector.load %arg12[%c24, %c0_145] : memref<32x256xf32, #tpu.memory_space<vmem>>, vector<8x256xf32>
    tpu.vector_store %arg12[%c24, %c0_145], %396 {strides = array<i32>} : memref<32x256xf32, #tpu.memory_space<vmem>>, vector<8x256xf32>,
    return
  }
  func.func @transform_0(%arg0: i32) -> (i32, i32) {
    %c0_i32 = arith.constant 0 : i32
    %c0_i32_0 = arith.constant 0 : i32
    return %c0_i32, %arg0 : i32, i32
  }
  func.func @transform_1(%arg0: i32) -> (i32, i32) {
    %c0_i32 = arith.constant 0 : i32
    %c0_i32_0 = arith.constant 0 : i32
    %c0_i32_1 = arith.constant 0 : i32
    return %c0_i32, %c0_i32_0 : i32, i32
  }
  func.func @transform_2(%arg0: i32) -> (i32, i32) {
    %c0_i32 = arith.constant 0 : i32
    %c0_i32_0 = arith.constant 0 : i32
    %c0_i32_1 = arith.constant 0 : i32
    return %c0_i32, %c0_i32_0 : i32, i32
  }
  func.func @transform_3(%arg0: i32) -> (i32, i32) {
    %c0_i32 = arith.constant 0 : i32
    %c0_i32_0 = arith.constant 0 : i32
    %c0_i32_1 = arith.constant 0 : i32
    return %c0_i32, %c0_i32_0 : i32, i32
  }
  func.func @transform_4(%arg0: i32) -> (i32, i32) {
    %c0_i32 = arith.constant 0 : i32
    %c0_i32_0 = arith.constant 0 : i32
    %c0_i32_1 = arith.constant 0 : i32
    return %c0_i32, %c0_i32_0 : i32, i32
  }
  func.func @transform_5(%arg0: i32) -> (i32, i32) {
    %c0_i32 = arith.constant 0 : i32
    %c0_i32_0 = arith.constant 0 : i32
    %c0_i32_1 = arith.constant 0 : i32
    return %c0_i32, %c0_i32_0 : i32, i32
  }
  func.func @transform_6(%arg0: i32) -> (i32, i32) {
    %c0_i32 = arith.constant 0 : i32
    %c0_i32_0 = arith.constant 0 : i32
    %c0_i32_1 = arith.constant 0 : i32
    return %c0_i32, %c0_i32_0 : i32, i32
  }
  func.func @transform_7(%arg0: i32) -> (i32, i32) {
    %c0_i32 = arith.constant 0 : i32
    %c0_i32_0 = arith.constant 0 : i32
    %c0_i32_1 = arith.constant 0 : i32
    return %c0_i32, %c0_i32_0 : i32, i32
  }
  func.func @transform_8(%arg0: i32) -> (i32, i32) {
    %c0_i32 = arith.constant 0 : i32
    %c0_i32_0 = arith.constant 0 : i32
    %c0_i32_1 = arith.constant 0 : i32
    return %c0_i32, %c0_i32_0 : i32, i32
  }
  func.func @transform_9(%arg0: i32) -> (i32, i32) {
    %c0_i32 = arith.constant 0 : i32
    %c0_i32_0 = arith.constant 0 : i32
    %c0_i32_1 = arith.constant 0 : i32
    return %c0_i32, %c0_i32_0 : i32, i32
  }
  func.func @transform_10(%arg0: i32) -> (i32, i32) {
    %c0_i32 = arith.constant 0 : i32
    %c0_i32_0 = arith.constant 0 : i32
    %c0_i32_1 = arith.constant 0 : i32
    return %c0_i32, %c0_i32_0 : i32, i32
  }
  func.func @transform_11(%arg0: i32) -> (i32, i32) {
    %c0_i32 = arith.constant 0 : i32
    %c0_i32_0 = arith.constant 0 : i32
    return %c0_i32, %arg0 : i32, i32
  }
}

</mosaic_0001>

<bundles_post_ra>
// kernel: inception_forward.1
= control target key start
LH: loop header
LB: loop body
LE: loop exit
PB: predicated region body
PF: predicated region fallthrough
CT: control target
= control target key end

     0   :  { %s1672_s17 = smov 0   ;;  %s1674_s18 = smov 0   ;;  %s2321_s0 = inlined_call_operand.vmem [shape: f32[4,512], index: 0, kind: input, shape index: {}]   ;;  %s2322_s1 = inlined_call_operand.vmem [shape: f32[24,4], index: 1, kind: input, shape index: {}]   ;;  %s2323_s2 = inlined_call_operand.vmem [shape: f32[24,1], index: 2, kind: input, shape index: {}]   ;;  %s2324_s3 = inlined_call_operand.vmem [shape: f32[8,72], index: 3, kind: input, shape index: {}]   ;;  %s2325_s4 = inlined_call_operand.vmem [shape: f32[8,1], index: 4, kind: input, shape index: {}]   ;;  %s2326_s5 = inlined_call_operand.vmem [shape: f32[8,72], index: 5, kind: input, shape index: {}]   ;;  %s2327_s6 = inlined_call_operand.vmem [shape: f32[8,1], index: 6, kind: input, shape index: {}]   ;;  %s2328_s7 = inlined_call_operand.vmem [shape: f32[8,72], index: 7, kind: input, shape index: {}]   ;;  %s2329_s8 = inlined_call_operand.vmem [shape: f32[8,1], index: 8, kind: input, shape index: {}]   ;;  %s2330_s9 = inlined_call_operand.vmem [shape: f32[8,4], index: 9, kind: input, shape index: {}]   ;;  %s2331_s10 = inlined_call_operand.vmem [shape: f32[8,1], index: 10, kind: input, shape index: {}]   ;;  %s2332_s11 = inlined_call_operand.vmem [shape: f32[32,512], index: 11, kind: output, shape index: {}]  }
   0x1   :  { %s1676_s19 = smov 0  }
   0x2 LB: > { %s1685_s20 = sadd.s32 4294967295, %s1600_s19   ;;  %s1687_s21 = sadd.s32 1, %s1600_s19   ;;  %s1600_s19 = sphi %s1676_s19, %s2392_s19   ;;  %s1596_s18 = sphi %s1674_s18, %s2391_s18   ;;  %s1592_s17 = sphi %s1672_s17, %s2390_s17  }
   0x3   : > { %s261_s22 = ssub.s32 %s1600_s19, %s1687_s21  ;;  %s264_s23 = sadd.s32 1, %s1596_s18 }
   0x4   : > { %p262_p0 = scmp.eq.s32.totalorder %s261_s22, 0  ;;  %p274_p1 = scmp.ne.s32.totalorder %s1596_s18, %s1592_s17 }
   0x5   : > { %p275_p2 = scmp.eq.s32.totalorder %s1685_s20, 1  ;;  %p1458_p3 = scmp.ge.s32.totalorder %s1600_s19, 1 }
   0x6   : > { %s1695_s24 = scalar_select %p262_p0, %s1596_s18, %s264_s23  }
   0x7   : > { %p1697_p4 = por %p275_p2, %p274_p1  ;;  %p338_p5 = scmp.lt.s32.totalorder %s1600_s19, 3 }
   0x9   : > { %p339_p6 = pnand %p1458_p3, %p338_p5 }
   0xa   : > { %s1460_s26 = sshll.u32 (!%p339_p6), %s1685_s20, 1  ;;  %v1602_v0 = vmov (!%p339_p6), 0.0   ;;  %v587_v1 = vld [vmem:[%s2323_s2 + $0x10] sm:$0xff] (!%p339_p6)  ;;  %v1603_v2 = vmov (!%p339_p6), 0   ;;  %vm2334_vm0 = vcmask (!%p339_p6), 1043456   ;;  %v582_v5 = vld [vmem:[%s2322_s1] sm:$0xff] (!%p339_p6)  ;;  %v385_v21 = vlaneseq (!%p339_p6) }
   0xb   : > { %342 = sbr.rel (%p339_p6) target bundleno = 995 (0x3e3), region = 64  ;;  %p378_p7 = scmp.lt.s32.totalorder (!%p339_p6), %s1460_s26, 3  ;;  %684 = vmatprep.mubr.f32.mxu0 (!%p339_p6), %v1602_v0  ;;  %860 = vmatprep.mubr.f32.mxu1 (!%p339_p6), %v1602_v0  ;;  %vm2333_vm1 = vcmask (!%p339_p6), 31744   ;;  %v583_v6 = vld [vmem:[%s2322_s1 + $0x8] sm:$0xff] (!%p339_p6)  ;;  %v584_v7 = vld [vmem:[%s2322_s1 + $0x10] sm:$0xff] (!%p339_p6)  ;;  %v938_v20 = vld [vmem:[%s2327_s6] sm:$0xff] (!%p339_p6) }
   0xc   : > { %1575 = vset.pattern.permute.xlu0 (!%p339_p6), %v1603_v2  ;;  %1576 = vset.pattern.permute.xlu1 (!%p339_p6), %v1603_v2  ;;  %s1605_s27 = smov (!%p339_p6), 17   ;;  %s1606_s28 = smov (!%p339_p6), 15   ;;  %v586_v19 = vld [vmem:[%s2323_s2 + $0x8] sm:$0xff] (!%p339_p6)  ;;  %v1785_v22 = vand.u32 (!%p339_p6), 127, %v385_v21 }
   0xd   : > { %600 = vperm.xlu0 (!%p339_p6), %1575, %v587_v1   ;;  %s1608_s30 = smov (!%p339_p6), 127   ;;  %s1609_s12 = smov (!%p339_p6), 113  }
   0xe   : > { %s1611_s14 = smov (!%p339_p6), 111   ;;  %v387_v23 = vadd.s32 (!%p339_p6), 128, %v1785_v22  ;;  %v392_v25 = vand.u32 (!%p339_p6), 255, %v1785_v22  ;;  %vm2341_vm9 = vcmp.lt.s32.totalorder (!%p339_p6), %v1785_v22, 16  ;;  %s374_s19 = sand.u32 (!%p339_p6), 1, %s1592_s17  }
  0x10   : > { %v1788_v24 = vand.u32 (!%p339_p6), 255, %v387_v23  ;;  %v416_v27 = vand.u32 (!%p339_p6), 15, %v392_v25  ;;  %v444_v33 = vadd.s32 (!%p339_p6), 4294967279, %v392_v25  ;;  %v1794_v34 = vadd.s32 (!%p339_p6), 4294967280, %v392_v25 }
  0x11   : > { %v500_v35 = vadd.s32 (!%p339_p6), 4294967295, %v392_v25  ;;  %v486_v39 = vadd.s32 (!%p339_p6), 4294967281, %v392_v25 }
  0x12   : > { %s2394_s26 = smov (!%p378_p7, %s1460_s26), 3  ;;  %v423_v26 = vand.u32 15, %v1788_v24  ;;  %v1792_v32 = vadd.s32 4294967295, %v416_v27  ;;  %v1796_v38 = vadd.s32 1, %v416_v27  ;;  %vm446_vm7 = vcmp.ge.s32.totalorder %v444_v33, 0  ;;  %s1492_s17 = sshll.u32 (%p1697_p4), %s1685_s20, 4 }
  0x13   : > { %s1461_s29 = sshll.u32 %s2394_s26, 2  ;;  %s1604_s26 = smov 16   ;;  %v527_v40 = vadd.s32 1, %v1788_v24  ;;  %vm2336_vm8 = vcmp.ge.s32.totalorder %v1794_v34, 0  ;;  %vm502_vm11 = vcmp.ge.s32.totalorder %v500_v35, 0  ;;  %vm488_vm14 = vcmp.ge.s32.totalorder %v486_v39, 0 }
  0x14   : > { %s381_s13 = scalar_lea.vmem %s2321_s0, %s1461_s29  ;;  %s1607_s29 = smov 1   ;;  %v479_v28 = vadd.s32 1, %v423_v26  ;;  %v437_v31 = vadd.s32 4294967295, %v423_v26  ;;  %vm2340_vm6 = vcmp.ge.s32.totalorder %v1792_v32, 0  ;;  %vm2335_vm13 = vcmp.lt.s32.totalorder %v1796_v38, 16 }
  0x15   : > { %v1710_v3 = vld [vmem:[%s381_s13] sm:$0xff]  ;;  %s1610_s13 = smov 112   ;;  %vm1813_vm15 = vmand %vm2340_vm6, %vm446_vm7  ;;  %v1820_v46 = vsel %vm2336_vm8, 1.0, %v1602_v0  ;;  %vm2338_vm7 = vcmp.lt.s32.totalorder %v1785_v22, 1  ;;  %v541_v58 = vadd.s32 15, %v1788_v24  ;;  %v569_v26 = vadd.s32 17, %v1788_v24 }
  0x16   : > { %v1714_v4 = vcombine.high %v1710_v3, %v1710_v3  ;;  %vm481_vm2 = vcmp.ge.s32.totalorder %v479_v28, 0  ;;  %vm483_vm3 = vcmp.lt.s32.totalorder %v479_v28, 16  ;;  %vm439_vm4 = vcmp.ge.s32.totalorder %v437_v31, 0 }
  0x17   : > { %vm441_vm5 = vcmp.lt.s32.totalorder %v437_v31, 16  ;;  %vm1802_vm10 = vmand %vm481_vm2, %vm483_vm3  ;;  %vm533_vm3 = vcmp.lt.s32.totalorder %v527_v40, 256  ;;  %v1847_v51 = vsel %vm1813_vm15, 1.0, %v1602_v0  ;;  %v1906_v27 = vsel %vm2335_vm13, 1.0, %v1602_v0 }
  0x18   : > { %1476 = vmatprep.subr.msk.mxu0 %vm2334_vm0, %v1714_v4  ;;  %vm1806_vm12 = vmand %vm439_vm4, %vm441_vm5  ;;  %vm2342_vm4 = vcmp.lt.s32.totalorder %v1785_v22, 15  ;;  %vm715_vm5 = vcmp.lt.s32.totalorder %v1785_v22, 17  ;;  %v1842_v50 = vsel %vm1802_vm10, 1.0, %v1602_v0 }
  0x19   : > { %1477 = vmatpush1.msk.msra.mxu0 %vm2334_vm0, %v1710_v3  ;;  %vm1826_vm2 = vmand %vm2340_vm6, %vm502_vm11  ;;  %v1852_v52 = vsel %vm1806_vm12, 1.0, %v1602_v0 }
  0x1a   : > { %1478 = vmatmul.mubr.msk.f32.vlgmr.msra.gmra.mrb[0].mxu0 %vm2333_vm1, %v582_v5  ;;  %v1858_v55 = vsel %vm1826_vm2, 1.0, %v1602_v0  ;;  %vm1862_vm11 = vmand %vm1802_vm10, %vm533_vm3  ;;  %vm547_vm3 = vcmp.lt.s32.totalorder %v541_v58, 256 }
  0x1b   : > { %690 = vmatprep.mubr.f32.mxu0 %v1602_v0  ;;  %vm1914_vm0 = vmand %vm1806_vm12, %vm547_vm3 }
  0x1c   : > { %v1926_v40 = vsel %vm1914_vm0, 1.0, %v1602_v0 }
  0x1e   : > { %1479 = vmatmul.mubr.msk.f32.gmra.mrb[2].mxu0 %vm2333_vm1, %v583_v6 }
  0x1f   : > { %696 = vmatprep.mubr.f32.mxu0 %v1602_v0 }
  0x22   : > { %1480 = vmatmul.mubr.msk.f32.gmra.mrb[4].mxu0 %vm2333_vm1, %v584_v7  ;;  %vm1835_vm1 = vmand %vm2335_vm13, %vm488_vm14  ;;  %vm2337_vm14 = vcmp.lt.s32.totalorder %v1785_v22, 127  ;;  %vm762_vm13 = vcmp.lt.s32.totalorder %v1785_v22, 113 }
  0x23   : > { %1011 = vmatprep.mubr.f32.mxu0 %v1602_v0  ;;  %v1886_v7 = vsel %vm1835_vm1, 1.0, %v1602_v0 }
  0x8c   : > { %v601_v12 = vpop.permute.xlu0 %600 }
  0xed   : > { %v1735_v8 = vpop.f32.mrb[0].mxu0 }
  0xee   : > { %v1737_v9 = vpop.f32.mrb[1].mxu0 }
  0xf1   : > { %v1739_v10 = vpop.f32.mrb[2].mxu0 }
  0xf2   : > { %v1741_v11 = vpop.f32.mrb[3].mxu0 }
  0xf5   : > { %v698_v13 = vpop.f32.mrb[4].mxu0 }
  0xf6   : > { %v699_v14 = vadd.f32 %v698_v13, %v601_v12  ;;  %v700_v15 = vpop.f32.mrb[5].mxu0  ;;  %v1894_v13 = vadd.s32 16, %v1788_v24 }
  0xf7   : > { %v701_v17 = vadd.f32 %v700_v15, %v601_v12  ;;  %v1891_v12 = vsel %vm1862_vm11, 1.0, %v1602_v0 }
  0xf8   : > { %v1743_v16 = vmax.f32 %v699_v14, 0.0  ;;  %vm2339_vm8 = vcmp.lt.s32.totalorder %v1894_v13, 256 }
  0xf9   : > { %v1749_v18 = vmax.f32 %v701_v17, 0.0 }
  0xfa   : > { %879 = vrot.lane.b32.xlu1 %v1743_v16, %s1604_s26  ;;  %871 = vrot.lane.b32.xlu0 %v1743_v16, %s1605_s27 }
  0xfe   : > { %887 = vrot.lane.b32.xlu1 %v1743_v16, %s1606_s28  ;;  %881 = vrot.lane.b32.xlu0 %v1749_v18, %s1604_s26 }
 0x102   : > { %895 = vrot.lane.b32.xlu1 %v1743_v16, %s1607_s29  ;;  %889 = vrot.lane.b32.xlu0 %v1749_v18, %s1606_s28 }
 0x106   : > { %873 = vrot.lane.b32.xlu1 %v1749_v18, %s1605_s27  ;;  %897 = vrot.lane.b32.xlu0 %v1749_v18, %s1607_s29 }
 0x10a   : > { %905 = vrot.lane.b32.xlu1 %v1743_v16, %s1608_s30  ;;  %907 = vrot.lane.b32.xlu0 %v1749_v18, %s1608_s30 }
 0x10e   : > { %913 = vrot.lane.b32.xlu1 %v1743_v16, %s1609_s12  ;;  %915 = vrot.lane.b32.xlu0 %v1749_v18, %s1609_s12 }
 0x112   : > { %921 = vrot.lane.b32.xlu1 %v1743_v16, %s1610_s13  ;;  %923 = vrot.lane.b32.xlu0 %v1749_v18, %s1610_s13 }
 0x116   : > { %929 = vrot.lane.b32.xlu1 %v1743_v16, %s1611_s14  ;;  %931 = vrot.lane.b32.xlu0 %v1749_v18, %s1611_s14 }
 0x11a   : > { %595 = vperm.xlu1 %1576, %v586_v19   ;;  %941 = vperm.xlu0 %1575, %v938_v20  }
 0x16c   : > { %v880_v29 = vpop.permute.xlu1 %879  ;;  %v872_v30 = vpop.permute.xlu0 %871 }
 0x170   : > { %v888_v36 = vpop.permute.xlu1 %887  ;;  %v882_v37 = vpop.permute.xlu0 %881 }
 0x171   : > { %v884_v47 = vsel %vm2341_vm9, %v882_v37, %v880_v29  ;;  %v883_v6 = vsel %vm2341_vm9, %v880_v29, %v882_v37 }
 0x172   : > { %v885_v53 = vmul.f32 %v1820_v46, %v884_v47 }
 0x174   : > { %v896_v43 = vpop.permute.xlu1 %895  ;;  %v890_v44 = vpop.permute.xlu0 %889 }
 0x175   : > { %v891_v59 = vsel %vm2342_vm4, %v888_v36, %v890_v44  ;;  %v892_v14 = vsel %vm2342_vm4, %v890_v44, %v888_v36  ;;  %v1933_v44 = vsel %vm2339_vm8, 1.0, %v1602_v0  ;;  %vm780_vm8 = vcmp.lt.s32.totalorder %v1785_v22, 111 }
 0x176   : > { %v894_v15 = vmul.f32 %v1842_v50, %v891_v59  ;;  %v893_v31 = vmul.f32 %v1886_v7, %v892_v14 }
 0x178   : > { %v874_v54 = vpop.permute.xlu1 %873  ;;  %v898_v56 = vpop.permute.xlu0 %897 }
 0x179   : > { %v875_v60 = vsel %vm715_vm5, %v872_v30, %v874_v54  ;;  %v876_v61 = vsel %vm715_vm5, %v874_v54, %v872_v30  ;;  %v899_v62 = vsel %vm2338_vm7, %v896_v43, %v898_v56  ;;  %v900_v2 = vsel %vm2338_vm7, %v898_v56, %v896_v43 }
 0x17a   : > { %v877_v63 = vmul.f32 %v1847_v51, %v876_v61  ;;  %v878_v1 = vmul.f32 %v1852_v52, %v875_v60  ;;  %v902_v5 = vmul.f32 %v1852_v52, %v899_v62  ;;  %v901_v23 = vmul.f32 %v1858_v55, %v900_v2 }
 0x17b   : > { %vm771_vm7 = vcmp.lt.s32.totalorder %v1785_v22, 112 }
 0x17c   : > { %v1511_v17 = vpack.c.bf16 %v885_v53, %v877_v63  ;;  %v906_v19 = vpop.permute.xlu1 %905  ;;  %v908_v20 = vpop.permute.xlu0 %907  ;;  %v1509_v21 = vpack.c.bf16 %v883_v6, %v878_v1  ;;  %v1513_v30 = vpack.c.bf16 %v902_v5, %v894_v15  ;;  %v1515_v36 = vpack.c.bf16 %v901_v23, %v893_v31 }
 0x17d   : > { %v910_v25 = vsel %vm2337_vm14, %v908_v20, %v906_v19  ;;  %v909_v28 = vsel %vm2337_vm14, %v906_v19, %v908_v20  ;;  %vm575_vm14 = vcmp.lt.s32.totalorder %v569_v26, 256  ;;  %v937_v20 = vld [vmem:[%s2326_s5] sm:$0xff] }
 0x17e   : > { %v912_v29 = vmul.f32 %v1891_v12, %v910_v25  ;;  %1510 = vmatprep.subr.bf16.mxu0 %v1509_v21  ;;  %v911_v37 = vmul.f32 %v1906_v27, %v909_v28  ;;  %vm1944_vm3 = vmand %vm1802_vm10, %vm575_vm14  ;;  %vm2343_vm14 = vcmask 588800  }
 0x17f   : > { %1512 = vmatpush1.bf16.msra.mxu0 %v1511_v17  ;;  %v1960_v1 = vsel %vm1944_vm3, 1.0, %v1602_v0 }
 0x180   : > { %v914_v33 = vpop.permute.xlu1 %913  ;;  %1514 = vmatprep.subr.bf16.mxu0 %v1513_v30  ;;  %v916_v35 = vpop.permute.xlu0 %915  ;;  %v1517_v39 = vpack.c.bf16 %v912_v29, %v1749_v18  ;;  %v1938_v18 = vsel %vm2340_vm6, 1.0, %v1602_v0  ;;  %v1519_v58 = vpack.c.bf16 %v911_v37, %v1743_v16  ;;  %vm2361_vm6 = vcmp.lt.s32.totalorder %v1785_v22, 1 }
 0x181   : > { %v918_v43 = vsel %vm762_vm13, %v916_v35, %v914_v33  ;;  %v917_v47 = vsel %vm762_vm13, %v914_v33, %v916_v35 }
 0x182   : > { %v920_v60 = vmul.f32 %v1926_v40, %v918_v43  ;;  %v919_v63 = vmul.f32 %v1938_v18, %v917_v47 }
 0x183   : > { %1516 = vmatpush1.bf16.msra.mxu0 %v1515_v36 }
 0x184   : > { %v922_v53 = vpop.permute.xlu1 %921  ;;  %1518 = vmatprep.subr.bf16.mxu0 %v1517_v39  ;;  %v924_v54 = vpop.permute.xlu0 %923 }
 0x185   : > { %v926_v59 = vsel %vm771_vm7, %v924_v54, %v922_v53  ;;  %v925_v61 = vsel %vm771_vm7, %v922_v53, %v924_v54 }
 0x186   : > { %v928_v62 = vmul.f32 %v1933_v44, %v926_v59  ;;  %v1523_v6 = vpack.c.bf16 %v925_v61, %v919_v63 }
 0x187   : > { %1520 = vmatpush1.bf16.msra.mxu0 %v1519_v58 }
 0x188   : > { %v930_v16 = vpop.permute.xlu1 %929  ;;  %v932_v2 = vpop.permute.xlu0 %931  ;;  %v1521_v5 = vpack.c.bf16 %v928_v62, %v920_v60 }
 0x189   : > { %v934_v14 = vsel %vm780_vm8, %v932_v2, %v930_v16  ;;  %v933_v15 = vsel %vm780_vm8, %v930_v16, %v932_v2 }
 0x18a   : > { %v936_v17 = vmul.f32 %v1960_v1, %v934_v14  ;;  %1522 = vmatprep.subr.bf16.mxu0 %v1521_v5  ;;  %v935_v19 = vmul.f32 %v1906_v27, %v933_v15 }
 0x18b   : > { %1524 = vmatpush1.bf16.msra.mxu0 %v1523_v6 }
 0x18c   : > { %963 = vmatprep.subr.mxu0 %v936_v17 }
 0x18f   : > { %964 = vmatpush1.msra.mxu0 %v935_v19 }
 0x190   : > { %1482 = vmatmul.mubr.msk.f32.vlgmr.msra.gmra.mrb[6].mxu0 %vm2343_vm14, %v937_v20 }
 0x191   : > { %1352 = vmatprep.mubr.f32.mxu0 %v1602_v0 }
 0x199   : > { %v596_v21 = vpop.permute.xlu1 %595 }
 0x19a   : > { %v693_v23 = vadd.f32 %v1739_v10, %v596_v21  ;;  %v695_v25 = vadd.f32 %v1741_v11, %v596_v21  ;;  %v2039_v10 = vpop.permute.xlu0 %941 }
 0x19c   : > { %v1975_v26 = vmax.f32 %v693_v23, 0.0  ;;  %v1977_v28 = vmax.f32 %v695_v25, 0.0 }
 0x19e   : > { %711 = vrot.lane.b32.xlu1 %v1975_v26, %s1605_s27  ;;  %713 = vrot.lane.b32.xlu0 %v1977_v28, %s1605_s27 }
 0x1a2   : > { %720 = vrot.lane.b32.xlu1 %v1975_v26, %s1604_s26  ;;  %722 = vrot.lane.b32.xlu0 %v1977_v28, %s1604_s26 }
 0x1a6   : > { %729 = vrot.lane.b32.xlu1 %v1975_v26, %s1606_s28  ;;  %731 = vrot.lane.b32.xlu0 %v1977_v28, %s1606_s28 }
 0x1aa   : > { %738 = vrot.lane.b32.xlu1 %v1975_v26, %s1607_s29  ;;  %740 = vrot.lane.b32.xlu0 %v1977_v28, %s1607_s29 }
 0x1ae   : > { %749 = vrot.lane.b32.xlu1 %v1975_v26, %s1608_s30  ;;  %751 = vrot.lane.b32.xlu0 %v1977_v28, %s1608_s30 }
 0x1b2   : > { %758 = vrot.lane.b32.xlu1 %v1975_v26, %s1609_s12  ;;  %760 = vrot.lane.b32.xlu0 %v1977_v28, %s1609_s12 }
 0x1b6   : > { %767 = vrot.lane.b32.xlu1 %v1975_v26, %s1610_s13  ;;  %769 = vrot.lane.b32.xlu0 %v1977_v28, %s1610_s13 }
 0x1ba   : > { %776 = vrot.lane.b32.xlu1 %v1975_v26, %s1611_s14  ;;  %778 = vrot.lane.b32.xlu0 %v1977_v28, %s1611_s14 }
 0x1be   : > { %1172 = vrot.lane.b32.xlu1 %v1710_v3, %s1605_s27  ;;  %1174 = vrot.lane.b32.xlu0 %v1714_v4, %s1605_s27 }
 0x1c2   : > { %1182 = vrot.lane.b32.xlu1 %v1710_v3, %s1604_s26  ;;  %1184 = vrot.lane.b32.xlu0 %v1714_v4, %s1604_s26 }
 0x1c6   : > { %1194 = vrot.lane.b32.xlu1 %v1710_v3, %s1606_s28  ;;  %1196 = vrot.lane.b32.xlu0 %v1714_v4, %s1606_s28 }
 0x1ca   : > { %1206 = vrot.lane.b32.xlu1 %v1710_v3, %s1607_s29  ;;  %1208 = vrot.lane.b32.xlu0 %v1714_v4, %s1607_s29 }
 0x1ce   : > { %1224 = vrot.lane.b32.xlu1 %v1710_v3, %s1608_s30  ;;  %1226 = vrot.lane.b32.xlu0 %v1714_v4, %s1608_s30 }
 0x1d2   : > { %1236 = vrot.lane.b32.xlu1 %v1710_v3, %s1609_s12  ;;  %1238 = vrot.lane.b32.xlu0 %v1714_v4, %s1609_s12 }
 0x1d6   : > { %1248 = vrot.lane.b32.xlu1 %v1710_v3, %s1610_s13  ;;  %1250 = vrot.lane.b32.xlu0 %v1714_v4, %s1610_s13 }
 0x210   : > { %v712_v11 = vpop.permute.xlu1 %711  ;;  %v714_v29 = vpop.permute.xlu0 %713 }
 0x211   : > { %v716_v30 = vsel %vm715_vm5, %v712_v11, %v714_v29  ;;  %v717_v31 = vsel %vm715_vm5, %v714_v29, %v712_v11 }
 0x212   : > { %v719_v36 = vmul.f32 %v1852_v52, %v716_v30  ;;  %v718_v43 = vmul.f32 %v1847_v51, %v717_v31 }
 0x214   : > { %v721_v33 = vpop.permute.xlu1 %720  ;;  %v723_v35 = vpop.permute.xlu0 %722 }
 0x215   : > { %v726_v37 = vsel %vm2341_vm9, %v723_v35, %v721_v33  ;;  %v725_v39 = vsel %vm2341_vm9, %v721_v33, %v723_v35  ;;  %vm2362_vm9 = vmmov %vm2361_vm6 }
 0x216   : > { %v727_v47 = vmul.f32 %v1820_v46, %v726_v37  ;;  %v1493_v53 = vpack.c.bf16 %v725_v39, %v719_v36 }
 0x218   : > { %v730_v54 = vpop.permute.xlu1 %729  ;;  %1494 = vmatprep.subr.bf16.mxu1 %v1493_v53  ;;  %v732_v58 = vpop.permute.xlu0 %731  ;;  %v1495_v59 = vpack.c.bf16 %v727_v47, %v718_v43 }
 0x219   : > { %v734_v60 = vsel %vm2342_vm4, %v730_v54, %v732_v58  ;;  %v735_v61 = vsel %vm2342_vm4, %v732_v58, %v730_v54  ;;  %vm2363_vm4 = vcmp.lt.s32.totalorder %v1785_v22, 127 }
 0x21a   : > { %1496 = vmatpush1.bf16.msra.mxu1 %v1495_v59  ;;  %v736_v5 = vmul.f32 %v1886_v7, %v735_v61  ;;  %v737_v6 = vmul.f32 %v1842_v50, %v734_v60 }
 0x21c   : > { %v739_v62 = vpop.permute.xlu1 %738  ;;  %v741_v63 = vpop.permute.xlu0 %740 }
 0x21d   : > { %v743_v16 = vsel %vm2361_vm6, %v739_v62, %v741_v63  ;;  %v744_v2 = vsel %vm2362_vm9, %v741_v63, %v739_v62  ;;  %vm2364_vm6 = vmmov %vm2363_vm4  ;;  %vm2365_vm9 = vcmp.lt.s32.totalorder %v1785_v22, 16 }
 0x21e   : > { %v745_v14 = vmul.f32 %v1858_v55, %v744_v2  ;;  %v746_v15 = vmul.f32 %v1852_v52, %v743_v16 }
 0x220   : > { %v750_v17 = vpop.permute.xlu1 %749  ;;  %v752_v19 = vpop.permute.xlu0 %751  ;;  %v1497_v20 = vpack.c.bf16 %v746_v15, %v737_v6  ;;  %v1499_v21 = vpack.c.bf16 %v745_v14, %v736_v5  ;;  %v785_v5 = vld [vmem:[%s2324_s3] sm:$0xff] }
 0x221   : > { %v754_v23 = vsel %vm2363_vm4, %v750_v17, %v752_v19  ;;  %v755_v25 = vsel %vm2364_vm6, %v752_v19, %v750_v17  ;;  %vm2366_vm4 = vmmov %vm2365_vm9  ;;  %vm2367_vm6 = vcmp.ge.s32.totalorder %v1794_v34, 0 }
 0x222   : > { %v756_v11 = vmul.f32 %v1906_v27, %v754_v23  ;;  %v757_v29 = vmul.f32 %v1891_v12, %v755_v25  ;;  %1498 = vmatprep.subr.bf16.mxu1 %v1497_v20  ;;  %v1273_v23 = vld [vmem:[%s2331_s10] sm:$0xff] }
 0x223   : > { %1500 = vmatpush1.bf16.msra.mxu1 %v1499_v21  ;;  %v1087_v21 = vld [vmem:[%s2329_s8] sm:$0xff] }
 0x224   : > { %v759_v30 = vpop.permute.xlu1 %758  ;;  %v761_v31 = vpop.permute.xlu0 %760  ;;  %v1501_v33 = vpack.c.bf16 %v757_v29, %v1977_v28  ;;  %v1503_v35 = vpack.c.bf16 %v756_v11, %v1975_v26 }
 0x225   : > { %v764_v36 = vsel %vm762_vm13, %v761_v31, %v759_v30  ;;  %v763_v37 = vsel %vm762_vm13, %v759_v30, %v761_v31 }
 0x226   : > { %1502 = vmatprep.subr.bf16.mxu1 %v1501_v33  ;;  %v766_v53 = vmul.f32 %v1926_v40, %v764_v36  ;;  %v765_v54 = vmul.f32 %v1938_v18, %v763_v37 }
 0x227   : > { %1504 = vmatpush1.bf16.msra.mxu1 %v1503_v35 }
 0x228   : > { %v768_v39 = vpop.permute.xlu1 %767  ;;  %v770_v43 = vpop.permute.xlu0 %769 }
 0x229   : > { %v773_v47 = vsel %vm771_vm7, %v770_v43, %v768_v39  ;;  %v772_v28 = vsel %vm771_vm7, %v768_v39, %v770_v43 }
 0x22a   : > { %v775_v26 = vmul.f32 %v1933_v44, %v773_v47  ;;  %v1507_v61 = vpack.c.bf16 %v772_v28, %v765_v54 }
 0x22c   : > { %v777_v58 = vpop.permute.xlu1 %776  ;;  %v779_v59 = vpop.permute.xlu0 %778  ;;  %v1505_v60 = vpack.c.bf16 %v775_v26, %v766_v53 }
 0x22d   : > { %v782_v62 = vsel %vm780_vm8, %v779_v59, %v777_v58  ;;  %v781_v63 = vsel %vm780_vm8, %v777_v58, %v779_v59 }
 0x22e   : > { %v784_v16 = vmul.f32 %v1960_v1, %v782_v62  ;;  %1506 = vmatprep.subr.bf16.mxu1 %v1505_v60  ;;  %v783_v2 = vmul.f32 %v1906_v27, %v781_v63 }
 0x22f   : > { %1508 = vmatpush1.bf16.msra.mxu1 %v1507_v61 }
 0x230   : > { %812 = vmatprep.subr.mxu1 %v784_v16  ;;  %v1173_v25 = vpop.permute.xlu1 %1172  ;;  %v1175_v11 = vpop.permute.xlu0 %1174 }
 0x231   : > { %v1177_v26 = vsel %vm715_vm5, %v1175_v11, %v1173_v25  ;;  %v1176_v54 = vsel %vm715_vm5, %v1173_v25, %v1175_v11 }
 0x232   : > { %v1180_v60 = vsel %vm1813_vm15, %v1177_v26, -inf  ;;  %v1181_v62 = vsel %vm1806_vm12, %v1176_v54, -inf  ;;  %vm2370_vm15 = vmmov %vm2366_vm4 }
 0x233   : > { %813 = vmatpush1.msra.mxu1 %v783_v2 }
 0x234   : > { %1481 = vmatmul.mubr.msk.f32.vlgmr.msra.gmra.mrb[0].mxu1 %vm2343_vm14, %v785_v5  ;;  %v1183_v29 = vpop.permute.xlu1 %1182  ;;  %v1185_v30 = vpop.permute.xlu0 %1184  ;;  %vm2368_vm14 = vcmp.lt.s32.totalorder %v1785_v22, 15 }
 0x235   : > { %1160 = vmatprep.mubr.f32.mxu1 %v1602_v0  ;;  %v585_v0 = vld [vmem:[%s2323_s2] sm:$0xff]  ;;  %v1187_v58 = vsel %vm2365_vm9, %v1185_v30, %v1183_v29  ;;  %v1186_v63 = vsel %vm2366_vm4, %v1183_v29, %v1185_v30  ;;  %vm2369_vm9 = vmmov %vm2368_vm14 }
 0x236   : > { %v1190_v16 = vsel %vm2367_vm6, %v1187_v58, -inf  ;;  %vm2376_vm6 = vcmp.lt.s32.totalorder %v1785_v22, 127 }
 0x238   : > { %v1195_v31 = vpop.permute.xlu1 %1194  ;;  %v1197_v33 = vpop.permute.xlu0 %1196 }
 0x239   : > { %v1198_v5 = vsel %vm2368_vm14, %v1195_v31, %v1197_v33  ;;  %v1199_v45 = vsel %vm2369_vm9, %v1197_v33, %v1195_v31  ;;  %vm2371_vm14 = vmmov %vm2366_vm4 }
 0x23a   : > { %v1202_v34 = vsel %vm1835_vm1, %v1199_v45, -inf  ;;  %vm2374_vm1 = vmmov %vm2369_vm9 }
 0x23c   : > { %v1207_v35 = vpop.permute.xlu1 %1206  ;;  %v1209_v36 = vpop.permute.xlu0 %1208 }
 0x240   : > { %v1225_v37 = vpop.permute.xlu1 %1224  ;;  %v1227_v39 = vpop.permute.xlu0 %1226 }
 0x244   : > { %v2148_v43 = vpop.permute.xlu1 %1236  ;;  %v2150_v47 = vpop.permute.xlu0 %1238 }
 0x248   : > { %v2152_v53 = vpop.permute.xlu1 %1248  ;;  %v2154_v28 = vpop.permute.xlu0 %1250 }
 0x249   : > { %v1252_v24 = vsel %vm771_vm7, %v2152_v53, %v2154_v28 }
 0x263   : > { %v1013_v6 = vpop.f32.mrb[6].mxu0 }
 0x264   : > { %v1014_v14 = vadd.f32 %v1013_v6, %v2039_v10  ;;  %v1015_v15 = vpop.f32.mrb[7].mxu0 }
 0x265   : > { %v1016_v17 = vadd.f32 %v1015_v15, %v2039_v10  ;;  %v786_v10 = vld [vmem:[%s2325_s4] sm:$0xff]  ;;  %v1192_v15 = vmax.f32 %v1180_v60, %v1190_v16 }
 0x266   : > { %v2096_v19 = vmax.f32 %v1014_v14, 0.0 }
 0x267   : > { %v2098_v20 = vmax.f32 %v1016_v17, 0.0  ;;  %v1193_v17 = vmax.f32 %v1181_v62, %v1186_v63  ;;  %v1204_v41 = vmax.f32 %v1192_v15, %v1202_v34  ;;  %v1228_v63 = vsel %vm2376_vm6, %v1225_v37, %v1227_v39 }
 0x268   : > { %1020 = vrot.lane.b32.xlu1 %v2096_v19, %s1605_s27 }
 0x269   : > { %1022 = vrot.lane.b32.xlu0 %v2098_v20, %s1605_s27 }
 0x26c   : > { %1028 = vrot.lane.b32.xlu1 %v2096_v19, %s1604_s26 }
 0x26d   : > { %1030 = vrot.lane.b32.xlu0 %v2098_v20, %s1604_s26  ;;  %s1459_s26 = sshll.u32 %s374_s19, 6 }
 0x26e   : > { %s2287_s27 = scalar_lea.vmem [#allocation2], %s1459_s26 }
 0x270   : > { %1036 = vrot.lane.b32.xlu1 %v2096_v19, %s1606_s28 }
 0x271   : > { %1038 = vrot.lane.b32.xlu0 %v2098_v20, %s1606_s28 }
 0x274   : > { %1044 = vrot.lane.b32.xlu1 %v2096_v19, %s1607_s29 }
 0x275   : > { %1046 = vrot.lane.b32.xlu0 %v2098_v20, %s1607_s29 }
 0x278   : > { %1054 = vrot.lane.b32.xlu1 %v2096_v19, %s1608_s30 }
 0x279   : > { %1056 = vrot.lane.b32.xlu0 %v2098_v20, %s1608_s30  ;;  %s1372_s30 = scalar_lea.vmem (%p1697_p4), %s2332_s11, %s1492_s17 }
 0x27c   : > { %1062 = vrot.lane.b32.xlu1 %v2096_v19, %s1609_s12 }
 0x27d   : > { %1064 = vrot.lane.b32.xlu0 %v2098_v20, %s1609_s12 }
 0x280   : > { %1070 = vrot.lane.b32.xlu1 %v2096_v19, %s1610_s13 }
 0x281   : > { %1072 = vrot.lane.b32.xlu0 %v2098_v20, %s1610_s13 }
 0x284   : > { %1260 = vrot.lane.b32.xlu1 %v1710_v3, %s1611_s14 }
 0x285   : > { %1262 = vrot.lane.b32.xlu0 %v1714_v4, %s1611_s14 }
 0x288   : > { %1078 = vrot.lane.b32.xlu1 %v2096_v19, %s1611_s14 }
 0x289   : > { %1080 = vrot.lane.b32.xlu0 %v2098_v20, %s1611_s14 }
 0x28c   : > { %590 = vperm.xlu1 %1576, %v585_v0  }
 0x28d   : > { %789 = vperm.xlu0 %1575, %v786_v10  }
 0x290   : > { %1090 = vperm.xlu1 %1576, %v1087_v21   ;;  %v1203_v21 = vsel %vm1802_vm10, %v1198_v5, -inf  ;;  %vm2375_vm10 = vmmov %vm2374_vm1 }
 0x291   : > { %1276 = vperm.xlu0 %1575, %v1273_v23   ;;  %v1205_v58 = vmax.f32 %v1193_v17, %v1203_v21 }
 0x2da   : > { %v1021_v59 = vpop.permute.xlu1 %1020 }
 0x2db   : > { %v1023_v61 = vpop.permute.xlu0 %1022 }
 0x2dc   : > { %v1024_v2 = vsel %vm715_vm5, %v1021_v59, %v1023_v61  ;;  %v1025_v6 = vsel %vm715_vm5, %v1023_v61, %v1021_v59  ;;  %vm2372_vm5 = vcmp.lt.s32.totalorder %v1785_v22, 1 }
 0x2dd   : > { %v1027_v0 = vmul.f32 %v1852_v52, %v1024_v2  ;;  %v1211_v11 = vsel %vm2372_vm5, %v1209_v36, %v1207_v35  ;;  %v1026_v29 = vmul.f32 %v1847_v51, %v1025_v6  ;;  %vm2373_vm4 = vmmov %vm2372_vm5 }
 0x2de   : > { %v1029_v14 = vpop.permute.xlu1 %1028  ;;  %v1210_v49 = vsel %vm2373_vm4, %v1207_v35, %v1209_v36  ;;  %v1214_v59 = vsel %vm1826_vm2, %v1211_v11, -inf  ;;  %vm2377_vm9 = vmmov %vm2373_vm4 }
 0x2df   : > { %v1031_v10 = vpop.permute.xlu0 %1030  ;;  %v1215_v60 = vsel %vm1806_vm12, %v1210_v49, -inf  ;;  %v1216_v36 = vmax.f32 %v1204_v41, %v1214_v59  ;;  %vm2378_vm2 = vmmov %vm2373_vm4  ;;  %vm2388_vm4 = vcmask 31744  }
 0x2e0   : > { %v1032_v23 = vsel %vm2370_vm15, %v1029_v14, %v1031_v10  ;;  %v1033_v25 = vsel %vm2371_vm14, %v1031_v10, %v1029_v14  ;;  %v1217_v62 = vmax.f32 %v1205_v58, %v1215_v60  ;;  %vm2379_vm12 = vmmov %vm2376_vm6  ;;  %vm2380_vm15 = vcmp.lt.s32.totalorder %v1796_v38, 16 }
 0x2e1   : > { %v1034_v30 = vmul.f32 %v1820_v46, %v1033_v25  ;;  %v1525_v31 = vpack.c.bf16 %v1032_v23, %v1027_v0  ;;  %v1229_v6 = vsel %vm2379_vm12, %v1227_v39, %v1225_v37  ;;  %v1222_v15 = vmax.f32 %v1216_v36, %v1710_v3  ;;  %vm2381_vm14 = vmmov %vm2376_vm6 }
 0x2e2   : > { %v1037_v33 = vpop.permute.xlu1 %1036  ;;  %v1223_v34 = vmax.f32 %v1217_v62, %v1714_v4  ;;  %vm2382_vm5 = vmmov %vm2376_vm6  ;;  %v1240_v3 = vsel %vm762_vm13, %v2148_v43, %v2150_v47  ;;  %v1241_v39 = vsel %vm762_vm13, %v2150_v47, %v2148_v43  ;;  %v1253_v43 = vsel %vm771_vm7, %v2154_v28, %v2152_v53 }
 0x2e3   : > { %v1527_v26 = vpack.c.bf16 %v1034_v30, %v1026_v29  ;;  %1526 = vmatprep.subr.bf16.mxu1 %v1525_v31  ;;  %v1039_v54 = vpop.permute.xlu0 %1038 }
 0x2e4   : > { %v1040_v46 = vsel %vm2374_vm1, %v1037_v33, %v1039_v54  ;;  %v1041_v51 = vsel %vm2375_vm10, %v1039_v54, %v1037_v33  ;;  %vm2389_vm1 = vcmask 588800  }
 0x2e5   : > { %1528 = vmatpush1.bf16.msra.mxu1 %v1527_v26  ;;  %v1042_v16 = vmul.f32 %v1886_v7, %v1041_v51  ;;  %v1043_v2 = vmul.f32 %v1842_v50, %v1040_v46  ;;  %v1232_v7 = vsel %vm2380_vm15, %v1228_v63, -inf }
 0x2e6   : > { %v1045_v35 = vpop.permute.xlu1 %1044  ;;  %v1234_v23 = vmax.f32 %v1222_v15, %v1232_v7 }
 0x2e7   : > { %v1047_v61 = vpop.permute.xlu0 %1046 }
 0x2e8   : > { %v1048_v48 = vsel %vm2377_vm9, %v1045_v35, %v1047_v61  ;;  %v1049_v42 = vsel %vm2378_vm2, %v1047_v61, %v1045_v35 }
 0x2e9   : > { %v1050_v5 = vmul.f32 %v1858_v55, %v1049_v42  ;;  %v1051_v45 = vmul.f32 %v1852_v52, %v1048_v48  ;;  %v1233_v55 = vsel %vm1862_vm11, %v1229_v6, -inf  ;;  %vm2383_vm11 = vcmp.ge.s32.totalorder %v1792_v32, 0  ;;  %v1272_v48 = vld [vmem:[%s2330_s9] sm:$0xff] }
 0x2ea   : > { %v1055_v14 = vpop.permute.xlu1 %1054  ;;  %v1235_v29 = vmax.f32 %v1223_v34, %v1233_v55  ;;  %v1244_v30 = vsel %vm2383_vm11, %v1240_v3, -inf }
 0x2eb   : > { %v1531_v17 = vpack.c.bf16 %v1050_v5, %v1042_v16  ;;  %v1057_v0 = vpop.permute.xlu0 %1056  ;;  %v1529_v10 = vpack.c.bf16 %v1051_v45, %v1043_v2  ;;  %v1246_v31 = vmax.f32 %v1234_v23, %v1244_v30  ;;  %v1086_v2 = vld [vmem:[%s2328_s7] sm:$0xff] }
 0x2ec   : > { %v1058_v50 = vsel %vm2381_vm14, %v1055_v14, %v1057_v0  ;;  %v1059_v52 = vsel %vm2382_vm5, %v1057_v0, %v1055_v14 }
 0x2ed   : > { %v1060_v37 = vmul.f32 %v1906_v27, %v1058_v50  ;;  %v1061_v4 = vmul.f32 %v1891_v12, %v1059_v52  ;;  %1530 = vmatprep.subr.bf16.mxu1 %v1529_v10  ;;  %v1245_v12 = vsel %vm1914_vm0, %v1241_v39, -inf  ;;  %vm2384_vm0 = vcmp.lt.s32.totalorder %v1894_v13, 256 }
 0x2ee   : > { %v1063_v21 = vpop.permute.xlu1 %1062  ;;  %1532 = vmatpush1.bf16.msra.mxu1 %v1531_v17  ;;  %v1247_v49 = vmax.f32 %v1235_v29, %v1245_v12  ;;  %v1257_v41 = vsel %vm2384_vm0, %v1253_v43, -inf  ;;  %v1258_v46 = vmax.f32 %v1246_v31, %v1252_v24 }
 0x2ef   : > { %v1535_v57 = vpack.c.bf16 %v1060_v37, %v2096_v19  ;;  %v1065_v25 = vpop.permute.xlu0 %1064  ;;  %v1533_v11 = vpack.c.bf16 %v1061_v4, %v2098_v20 }
 0x2f0   : > { %v1067_v47 = vsel %vm762_vm13, %v1065_v25, %v1063_v21  ;;  %v1066_v20 = vsel %vm762_vm13, %v1063_v21, %v1065_v25  ;;  %v1259_v53 = vmax.f32 %v1247_v49, %v1257_v41  ;;  %vm2385_vm13 = vmmov %vm2380_vm15 }
 0x2f1   : > { %1534 = vmatprep.subr.bf16.mxu1 %v1533_v11  ;;  %v1069_v26 = vmul.f32 %v1926_v40, %v1067_v47  ;;  %v1068_v59 = vmul.f32 %v1938_v18, %v1066_v20 }
 0x2f2   : > { %v1071_v19 = vpop.permute.xlu1 %1070  ;;  %1536 = vmatpush1.bf16.msra.mxu1 %v1535_v57 }
 0x2f3   : > { %v1073_v32 = vpop.permute.xlu0 %1072 }
 0x2f4   : > { %v1075_v33 = vsel %vm771_vm7, %v1073_v32, %v1071_v19  ;;  %v1074_v54 = vsel %vm771_vm7, %v1071_v19, %v1073_v32  ;;  %vm2386_vm7 = vcmask 1043456  }
 0x2f5   : > { %v1077_v58 = vmul.f32 %v1933_v44, %v1075_v33  ;;  %v1539_v28 = vpack.c.bf16 %v1074_v54, %v1068_v59 }
 0x2f6   : > { %v1261_v60 = vpop.permute.xlu1 %1260 }
 0x2f7   : > { %v1263_v51 = vpop.permute.xlu0 %1262  ;;  %v1537_v35 = vpack.c.bf16 %v1077_v58, %v1069_v26 }
 0x2f8   : > { %v1264_v36 = vsel %vm780_vm8, %v1261_v60, %v1263_v51  ;;  %v1265_v13 = vsel %vm780_vm8, %v1263_v51, %v1261_v60 }
 0x2f9   : > { %v1268_v40 = vsel %vm2385_vm13, %v1264_v36, -inf  ;;  %v1269_v44 = vsel %vm1944_vm3, %v1265_v13, -inf  ;;  %1538 = vmatprep.subr.bf16.mxu1 %v1537_v35  ;;  %vm2387_vm3 = vmmov %vm2386_vm7 }
 0x2fa   : > { %v1270_v18 = vmax.f32 %v1258_v46, %v1268_v40  ;;  %v1271_v61 = vmax.f32 %v1259_v53, %v1269_v44  ;;  %v1079_v62 = vpop.permute.xlu1 %1078  ;;  %1540 = vmatpush1.bf16.msra.mxu1 %v1539_v28 }
 0x2fb   : > { %v1081_v63 = vpop.permute.xlu0 %1080 }
 0x2fc   : > { %v1082_v42 = vsel %vm780_vm8, %v1079_v62, %v1081_v63  ;;  %v1083_v38 = vsel %vm780_vm8, %v1081_v63, %v1079_v62  ;;  %1484 = vmatprep.subr.msk.mxu0 %vm2386_vm7, %v1271_v61 }
 0x2fd   : > { %v1084_v56 = vmul.f32 %v1906_v27, %v1082_v42  ;;  %v1085_v16 = vmul.f32 %v1960_v1, %v1083_v38  ;;  %1485 = vmatpush1.msk.msra.mxu0 %vm2387_vm3, %v1270_v18 }
 0x2fe   : > { %1486 = vmatmul.mubr.msk.f32.vlgmr.msra.gmra.mrb[8].mxu0 %vm2388_vm4, %v1272_v48 }
 0x2ff   : > { %1112 = vmatprep.subr.mxu1 %v1085_v16 }
 0x300   : > { %1113 = vmatpush1.msra.mxu1 %v1084_v56 }
 0x301   : > { %1483 = vmatmul.mubr.msk.f32.vlgmr.msra.gmra.mrb[2].mxu1 %vm2389_vm1, %v1086_v2 }
 0x307   : > { %v862_v22 = vpop.f32.mrb[0].mxu1 }
 0x308   : > { %v864_v5 = vpop.f32.mrb[1].mxu1 }
 0x30b   : > { %v591_v45 = vpop.permute.xlu1 %590 }
 0x30c   : > { %v687_v27 = vadd.f32 %v1735_v8, %v591_v45  ;;  %v689_v1 = vadd.f32 %v1737_v9, %v591_v45  ;;  %v790_v6 = vpop.permute.xlu0 %789 }
 0x30d   : > { %v863_v14 = vadd.f32 %v862_v22, %v790_v6  ;;  %v865_v15 = vadd.f32 %v864_v5, %v790_v6 }
 0x30e   : > { %v703_v17 = vmax.f32 %v687_v27, 0.0  ;;  %v704_v0 = vmax.f32 %v689_v1, 0.0 }
 0x30f   : > { %v867_v10 = vmax.f32 %v863_v14, 0.0  ;;  %v868_v34 = vmax.f32 %v865_v15, 0.0  ;;  %v1091_v55 = vpop.permute.xlu1 %1090 }
 0x310   : > { %709 = vst [vmem:[%s2287_s27] sm:$0xff] %v703_v17  ;;  %710 = vst [vmem:[%s2287_s27 + $0x8] sm:$0xff] %v704_v0  ;;  %v1277_v8 = vpop.permute.xlu0 %1276 }
 0x311   : > { %869 = vst [vmem:[%s2287_s27 + $0x10] sm:$0xff] %v867_v10  ;;  %870 = vst [vmem:[%s2287_s27 + $0x18] sm:$0xff] %v868_v34 }
 0x317   : > { %v1385_v11 = vld [vmem:[%s2287_s27] sm:$0xff] (%p1697_p4)  ;;  %v1387_v29 = vld [vmem:[%s2287_s27 + $0x8] sm:$0xff] (%p1697_p4) }
 0x318   : > { %v1389_v30 = vld [vmem:[%s2287_s27 + $0x10] sm:$0xff] (%p1697_p4)  ;;  %v1391_v12 = vld [vmem:[%s2287_s27 + $0x18] sm:$0xff] (%p1697_p4)  ;;  %1386 = vst [vmem:[%s1372_s30] sm:$0xff] (%p1697_p4), %v1385_v11  ;;  %1388 = vst [vmem:[%s1372_s30 + $0x8] sm:$0xff] (%p1697_p4), %v1387_v29 }
 0x319   : > { %1390 = vst [vmem:[%s1372_s30 + $0x20] sm:$0xff] (%p1697_p4), %v1389_v30  ;;  %1392 = vst [vmem:[%s1372_s30 + $0x28] sm:$0xff] (%p1697_p4), %v1391_v12 }
 0x3d1   : > { %v1354_v9 = vpop.f32.mrb[8].mxu0 }
 0x3d2   : > { %v1355_v7 = vadd.f32 %v1354_v9, %v1277_v8  ;;  %v1356_v50 = vpop.f32.mrb[9].mxu0 }
 0x3d3   : > { %v1357_v52 = vadd.f32 %v1356_v50, %v1277_v8 }
 0x3d4   : > { %v1359_v3 = vmax.f32 %v1355_v7, 0.0  ;;  %v1162_v37 = vpop.f32.mrb[2].mxu1  ;;  %1369 = sbr.rel (!%p1697_p4) target bundleno = 995 (0x3e3), region = 68 }
 0x3d5   : > { %v1360_v4 = vmax.f32 %v1357_v52, 0.0  ;;  %v1163_v39 = vadd.f32 %v1162_v37, %v1091_v55  ;;  %v1164_v21 = vpop.f32.mrb[3].mxu1 }
 0x3d6   : > { %1361 = vst [vmem:[%s2287_s27 + $0x30] sm:$0xff] %v1359_v3  ;;  %v1165_v23 = vadd.f32 %v1164_v21, %v1091_v55 }
 0x3d7   : > { %1362 = vst [vmem:[%s2287_s27 + $0x38] sm:$0xff] %v1360_v4  ;;  %v1167_v57 = vmax.f32 %v1163_v39, 0.0 }
 0x3d8   : > { %v1168_v25 = vmax.f32 %v1165_v23, 0.0 }
 0x3d9   : > { %1169 = vst [vmem:[%s2287_s27 + $0x20] sm:$0xff] %v1167_v57 }
 0x3da   : > { %1170 = vst [vmem:[%s2287_s27 + $0x28] sm:$0xff] %v1168_v25 }
 0x3dd   : > { %v1397_v19 = vld [vmem:[%s2287_s27 + $0x30] sm:$0xff] }
 0x3de   : > { %v1399_v31 = vld [vmem:[%s2287_s27 + $0x38] sm:$0xff]  ;;  %1398 = vst [vmem:[%s1372_s30 + $0x60] sm:$0xff] %v1397_v19 }
 0x3df   : > { %1400 = vst [vmem:[%s1372_s30 + $0x68] sm:$0xff] %v1399_v31 }
 0x3e0   : > { %v1393_v43 = vld [vmem:[%s2287_s27 + $0x20] sm:$0xff] }
 0x3e1   : > { %v1395_v47 = vld [vmem:[%s2287_s27 + $0x28] sm:$0xff]  ;;  %1394 = vst [vmem:[%s1372_s30 + $0x40] sm:$0xff] %v1393_v43 }
 0x3e2   : > { %1396 = vst [vmem:[%s1372_s30 + $0x48] sm:$0xff] %v1395_v47 }
 0x3e3 PF: > { %p18_p8 = scmp.ge.s32.totalorder %s1687_s21, 4   ;;  %s2390_s17 = smov %s1596_s18 }
 0x3e4   : > { %s2391_s18 = smov %s1695_s24  ;;  %s2392_s19 = smov %s1687_s21 }
 0x3e5   :  { %20 = sbr.rel (!%p18_p8) target bundleno = 2 (0x2), region = 117 }

</bundles_post_ra>
